<compile_context>
chip_gen: v5e
topology: v5e:2x2
jax: 0.10.0
libtpu: 0.0.40
codegen_flags: <defaults>
</compile_context>

<pallas_src>
import jax
import jax.numpy as jnp
import numpy as np
from jax.experimental import pallas as pl
from jax.experimental.pallas import tpu as pltpu


_SQRT_2_OVER_PI = 0.7978845608028654


def _gelu_tanh(x):
    # tanh-approximate GELU: 0.5*x*(1 + tanh(sqrt(2/pi)*(x + 0.044715*x^3))).
    # |err| vs exact erf-GELU <= ~3e-3 — well inside the test tolerance — and the
    # transcendental lowers to the EUP instead of burning VALU slots.
    return 0.5 * x * (1.0 + jnp.tanh(_SQRT_2_OVER_PI * (x + 0.044715 * x * x * x)))


def _make_kernel(ew_dtype):
    """Build the fused 3-layer MLP + normalize kernel with a chosen elementwise dtype."""

    def kernel(x_ref, w1_ref, b1_ref, w2_ref, b2_ref, w3_ref, b3_ref, o_ref):
        x = x_ref[...]                                                   # (TB, Din) bf16

        # ---- common_fc: Linear(Din, 512), f32 accumulation on the MXU ----------
        h = jnp.dot(x, w1_ref[...], preferred_element_type=jnp.float32) + b1_ref[...]

        # ---- feature_extractor: GELU -> Linear(512, 512) -> GELU ----------------
        g1 = _gelu_tanh(h.astype(ew_dtype)).astype(jnp.bfloat16)
        f = jnp.dot(g1, w2_ref[...], preferred_element_type=jnp.float32) + b2_ref[...]
        g2 = _gelu_tanh(f.astype(ew_dtype)).astype(jnp.bfloat16)

        # ---- latent_fc: Linear(512, Dlat) (columns zero-padded to Dpad in glue) --
        z = jnp.dot(g2, w3_ref[...], preferred_element_type=jnp.float32) + b3_ref[...]

        # ---- F.normalize(z, dim=-1): z / max(||z||, eps) -------------------------
        # Padded lanes are exactly zero, so the sum of squares over Dpad == over Dlat.
        ss = jnp.sum(z * z, axis=-1, keepdims=True)
        inv_norm = jax.lax.rsqrt(jnp.maximum(ss, 1e-24))                 # EUP rsqrt
        o_ref[...] = z * inv_norm

    return kernel


def pack_ms_common_encoder_params(W1, b1, W2, b2, W3, b3):
    """One-time repacking of PyTorch-layout weights into kernel layout.

    Hoisted out of the forward path: the transposes / bf16 casts / lane padding read
    and write ~1.5 MiB of HBM, which at small batch is comparable to the kernel's own
    traffic.  Call once, reuse the result for every forward call.
    """
    H, Din = W1.shape
    Dlat = W3.shape[0]
    assert W2.shape == (H, H) and W3.shape == (Dlat, H)
    assert b1.shape == (H,) and b2.shape == (H,) and b3.shape == (Dlat,)
    Dpad = ((Dlat + 127) // 128) * 128   # lane-dense padded latent width
    return dict(
        w1=jnp.asarray(W1).T.astype(jnp.bfloat16),                                # (Din, H)
        b1=jnp.asarray(b1).reshape(1, H).astype(jnp.float32),
        w2=jnp.asarray(W2).T.astype(jnp.bfloat16),                                # (H, H)
        b2=jnp.asarray(b2).reshape(1, H).astype(jnp.float32),
        w3=jnp.pad(jnp.asarray(W3).T, ((0, 0), (0, Dpad - Dlat))).astype(jnp.bfloat16),
        b3=jnp.pad(jnp.asarray(b3), (0, Dpad - Dlat)).reshape(1, Dpad).astype(jnp.float32),
        dims=(Din, H, Dlat, Dpad),
    )


def _device_kind():
    try:
        return jax.devices()[0].device_kind.lower()
    except Exception:
        return ""


def _default_elementwise_dtype():
    # v6e/v7x have bf16 VALU/EUP (packed vregs = 2x elementwise throughput);
    # v5e does not, so keep elementwise math in f32 there.
    return jnp.float32 if "v5" in _device_kind() else jnp.bfloat16


def _choose_batch_tile(B):
    if B <= 64:
        # Tiny batch: one grid step; pad rows up to the bf16 sublane tile (16).
        return max(16, ((B + 15) // 16) * 16)
    # Match MXU row width: 128 on v5e (4x128x128), 256 on v6e/v7x (2x256x256).
    return 128 if "v5" in _device_kind() else 256


def ms_common_encoder_forward(x, packed, *, block_b=None, elementwise_dtype=None):
    """Pallas implementation of MSCommonEncoder.forward (eval mode).

    x:      (B, common_dim) f32
    packed: output of pack_ms_common_encoder_params(...)
    """
    Din, H, Dlat, Dpad = packed["dims"]
    B, Din_x = x.shape
    assert Din_x == Din

    TB = _choose_batch_tile(B) if block_b is None else block_b
    ew_dtype = (_default_elementwise_dtype()
                if elementwise_dtype is None else elementwise_dtype)

    Bp = ((B + TB - 1) // TB) * TB
    steps = Bp // TB

    # batch pad + bf16 activation cast (halves DMA bytes, native MXU dtype)
    xp = jnp.pad(x, ((0, Bp - B), (0, 0))).astype(jnp.bfloat16)           # (Bp, Din)

    flops = 2 * Bp * (Din * H + H * H + H * Dpad)
    transcendentals = Bp * (2 * H + 1)         # tanh in both GELU layers + rsqrt per row
    bytes_accessed = (xp.size * 2
                      + (packed["w1"].size + packed["w2"].size + packed["w3"].size) * 2
                      + (packed["b1"].size + packed["b2"].size + packed["b3"].size) * 4
                      + Bp * Dpad * 4)

    # Megacore-shard the batch axis only when each core gets >= 2 steps; otherwise a
    # tiny grid just duplicates the resident-weight DMA with nothing to hide it under.
    semantics = ("parallel",) if steps >= 4 else ("arbitrary",)

    out = pl.pallas_call(
        _make_kernel(ew_dtype),
        out_shape=jax.ShapeDtypeStruct((Bp, Dpad), jnp.float32),
        grid=(steps,),
        in_specs=[
            pl.BlockSpec((TB, Din), lambda i: (i, 0)),    # x row block
            pl.BlockSpec((Din, H), lambda i: (0, 0)),     # W1 (resident across steps)
            pl.BlockSpec((1, H), lambda i: (0, 0)),       # b1
            pl.BlockSpec((H, H), lambda i: (0, 0)),       # W2 (resident)
            pl.BlockSpec((1, H), lambda i: (0, 0)),       # b2
            pl.BlockSpec((H, Dpad), lambda i: (0, 0)),    # W3 (lane padded, resident)
            pl.BlockSpec((1, Dpad), lambda i: (0, 0)),    # b3 (lane padded)
        ],
        out_specs=pl.BlockSpec((TB, Dpad), lambda i: (i, 0)),
        compiler_params=pltpu.CompilerParams(dimension_semantics=semantics),
        cost_estimate=pl.CostEstimate(flops=flops,
                                      transcendentals=transcendentals,
                                      bytes_accessed=bytes_accessed),
    )(xp, packed["w1"], packed["b1"], packed["w2"], packed["b2"],
      packed["w3"], packed["b3"])

    return out[:B, :Dlat]


def reference_forward(x, W1, b1, W2, b2, W3, b3):
    """Pure-JAX f32 reference mirroring the PyTorch forward (eval mode)."""
    h = x @ W1.T + b1
    h = jax.nn.gelu(h, approximate=False)
    h = h @ W2.T + b2
    h = jax.nn.gelu(h, approximate=False)
    z = h @ W3.T + b3
    n = jnp.linalg.norm(z, axis=-1, keepdims=True)
    return z / jnp.maximum(n, 1e-12)


if __name__ == "__main__":
    B, COMMON_DIM, LATENT_DIM, H = 16, 256, 64, 512

    key = jax.random.PRNGKey(0)
    ks = jax.random.split(key, 7)

    def uinit(k, shape, fan_in):
        bound = 1.0 / np.sqrt(fan_in)
        return jax.random.uniform(k, shape, jnp.float32, -bound, bound)

    # parameters with the same shapes/layout as the PyTorch module
    W1 = uinit(ks[0], (H, COMMON_DIM), COMMON_DIM)     # common_fc
    b1 = uinit(ks[1], (H,), COMMON_DIM)
    W2 = uinit(ks[2], (H, H), H)                       # feature_extractor Linear
    b2 = uinit(ks[3], (H,), H)
    W3 = uinit(ks[4], (LATENT_DIM, H), H)              # latent_fc
    b3 = uinit(ks[5], (LATENT_DIM,), H)

    x = jax.random.normal(ks[6], (B, COMMON_DIM), jnp.float32)

    # pack weights once (hot path does no repacking)
    packed = pack_ms_common_encoder_params(W1, b1, W2, b2, W3, b3)
    packed = {k: (jax.block_until_ready(v) if isinstance(v, jax.Array) else v)
              for k, v in packed.items()}

    out = jax.block_until_ready(ms_common_encoder_forward(x, packed))
    ref = jax.block_until_ready(reference_forward(x, W1, b1, W2, b2, W3, b3))
    np.testing.assert_allclose(np.asarray(out), np.asarray(ref), atol=1e-2, rtol=1e-2)

    print("KERNEL_OK")
</pallas_src>

<mosaic_0001>
module attributes {stable_mosaic.version = 11 : i64} {
  func.func @kernel(%arg0: i32, %arg1: memref<16x256xbf16, #tpu.memory_space<vmem>>, %arg2: memref<256x512xbf16, #tpu.memory_space<vmem>>, %arg3: memref<1x512xf32, #tpu.memory_space<vmem>>, %arg4: memref<512x512xbf16, #tpu.memory_space<vmem>>, %arg5: memref<1x512xf32, #tpu.memory_space<vmem>>, %arg6: memref<512x128xbf16, #tpu.memory_space<vmem>>, %arg7: memref<1x128xf32, #tpu.memory_space<vmem>>, %arg8: memref<16x128xf32, #tpu.memory_space<vmem>>) attributes {dimension_semantics = [#tpu.dimension_semantics<arbitrary>], iteration_bounds = array<i64: 1>, scalar_prefetch = 0 : i64, scratch_operands = 0 : i64, tpu.core_type = #tpu.core_type<tc>, window_params = [{transform_indices = @transform_0, window_bounds = array<i64: 16, 256>}, {pipeline_mode = #tpu.pipeline_mode<synchronous>, transform_indices = @transform_1, window_bounds = array<i64: 256, 512>}, {pipeline_mode = #tpu.pipeline_mode<synchronous>, transform_indices = @transform_2, window_bounds = array<i64: 1, 512>}, {pipeline_mode = #tpu.pipeline_mode<synchronous>, transform_indices = @transform_3, window_bounds = array<i64: 512, 512>}, {pipeline_mode = #tpu.pipeline_mode<synchronous>, transform_indices = @transform_4, window_bounds = array<i64: 1, 512>}, {pipeline_mode = #tpu.pipeline_mode<synchronous>, transform_indices = @transform_5, window_bounds = array<i64: 512, 128>}, {pipeline_mode = #tpu.pipeline_mode<synchronous>, transform_indices = @transform_6, window_bounds = array<i64: 1, 128>}, {transform_indices = @transform_7, window_bounds = array<i64: 16, 128>}]} {
    %c0 = arith.constant 0 : index
    %c0_0 = arith.constant 0 : index
    %0 = vector.load %arg1[%c0, %c0_0] : memref<16x256xbf16, #tpu.memory_space<vmem>>, vector<16x256xbf16>
    %c0_1 = arith.constant 0 : index
    %c0_2 = arith.constant 0 : index
    %1 = vector.load %arg2[%c0_1, %c0_2] : memref<256x512xbf16, #tpu.memory_space<vmem>>, vector<256x512xbf16>
    %cst = arith.constant dense<0.000000e+00> : vector<16x512xf32>
    %2 = tpu.matmul %0, %1, %cst {dimension_numbers = #tpu.dot_dimension_numbers<[1], [0], [0], [1], [0, 0, 1, 1], [], []>} : vector<16x256xbf16>, vector<256x512xbf16>, vector<16x512xf32> -> vector<16x512xf32>
    %c0_3 = arith.constant 0 : index
    %c0_4 = arith.constant 0 : index
    %3 = vector.load %arg3[%c0_3, %c0_4] : memref<1x512xf32, #tpu.memory_space<vmem>>, vector<1x512xf32>
    %4 = vector.broadcast %3 : vector<1x512xf32> to vector<16x512xf32>
    %5 = arith.addf %2, %4 : vector<16x512xf32>
    %6 = arith.truncf %5 : vector<16x512xf32> to vector<16x512xbf16>
    %cst_5 = arith.constant 5.000000e-01 : bf16
    %7 = vector.broadcast %cst_5 : bf16 to vector<16x512xbf16>
    %8 = arith.mulf %7, %6 : vector<16x512xbf16>
    %cst_6 = arith.constant 4.467770e-02 : bf16
    %9 = vector.broadcast %cst_6 : bf16 to vector<16x512xbf16>
    %10 = arith.mulf %9, %6 : vector<16x512xbf16>
    %11 = arith.mulf %10, %6 : vector<16x512xbf16>
    %12 = arith.mulf %11, %6 : vector<16x512xbf16>
    %13 = arith.addf %6, %12 : vector<16x512xbf16>
    %cst_7 = arith.constant 7.968750e-01 : bf16
    %14 = vector.broadcast %cst_7 : bf16 to vector<16x512xbf16>
    %15 = arith.mulf %14, %13 : vector<16x512xbf16>
    %16 = math.tanh %15 : vector<16x512xbf16>
    %cst_8 = arith.constant 1.000000e+00 : bf16
    %17 = vector.broadcast %cst_8 : bf16 to vector<16x512xbf16>
    %18 = arith.addf %17, %16 : vector<16x512xbf16>
    %19 = arith.mulf %8, %18 : vector<16x512xbf16>
    %c0_9 = arith.constant 0 : index
    %c0_10 = arith.constant 0 : index
    %20 = vector.load %arg4[%c0_9, %c0_10] : memref<512x512xbf16, #tpu.memory_space<vmem>>, vector<512x512xbf16>
    %cst_11 = arith.constant dense<0.000000e+00> : vector<16x512xf32>
    %21 = tpu.matmul %19, %20, %cst_11 {dimension_numbers = #tpu.dot_dimension_numbers<[1], [0], [0], [1], [0, 0, 1, 1], [], []>} : vector<16x512xbf16>, vector<512x512xbf16>, vector<16x512xf32> -> vector<16x512xf32>
    %c0_12 = arith.constant 0 : index
    %c0_13 = arith.constant 0 : index
    %22 = vector.load %arg5[%c0_12, %c0_13] : memref<1x512xf32, #tpu.memory_space<vmem>>, vector<1x512xf32>
    %23 = vector.broadcast %22 : vector<1x512xf32> to vector<16x512xf32>
    %24 = arith.addf %21, %23 : vector<16x512xf32>
    %25 = arith.truncf %24 : vector<16x512xf32> to vector<16x512xbf16>
    %cst_14 = arith.constant 5.000000e-01 : bf16
    %26 = vector.broadcast %cst_14 : bf16 to vector<16x512xbf16>
    %27 = arith.mulf %26, %25 : vector<16x512xbf16>
    %cst_15 = arith.constant 4.467770e-02 : bf16
    %28 = vector.broadcast %cst_15 : bf16 to vector<16x512xbf16>
    %29 = arith.mulf %28, %25 : vector<16x512xbf16>
    %30 = arith.mulf %29, %25 : vector<16x512xbf16>
    %31 = arith.mulf %30, %25 : vector<16x512xbf16>
    %32 = arith.addf %25, %31 : vector<16x512xbf16>
    %cst_16 = arith.constant 7.968750e-01 : bf16
    %33 = vector.broadcast %cst_16 : bf16 to vector<16x512xbf16>
    %34 = arith.mulf %33, %32 : vector<16x512xbf16>
    %35 = math.tanh %34 : vector<16x512xbf16>
    %cst_17 = arith.constant 1.000000e+00 : bf16
    %36 = vector.broadcast %cst_17 : bf16 to vector<16x512xbf16>
    %37 = arith.addf %36, %35 : vector<16x512xbf16>
    %38 = arith.mulf %27, %37 : vector<16x512xbf16>
    %c0_18 = arith.constant 0 : index
    %c0_19 = arith.constant 0 : index
    %39 = vector.load %arg6[%c0_18, %c0_19] : memref<512x128xbf16, #tpu.memory_space<vmem>>, vector<512x128xbf16>
    %cst_20 = arith.constant dense<0.000000e+00> : vector<16x128xf32>
    %40 = tpu.matmul %38, %39, %cst_20 {dimension_numbers = #tpu.dot_dimension_numbers<[1], [0], [0], [1], [0, 0, 1, 1], [], []>} : vector<16x512xbf16>, vector<512x128xbf16>, vector<16x128xf32> -> vector<16x128xf32>
    %c0_21 = arith.constant 0 : index
    %c0_22 = arith.constant 0 : index
    %41 = vector.load %arg7[%c0_21, %c0_22] : memref<1x128xf32, #tpu.memory_space<vmem>>, vector<1x128xf32>
    %42 = vector.broadcast %41 : vector<1x128xf32> to vector<16x128xf32>
    %43 = arith.addf %40, %42 : vector<16x128xf32>
    %44 = arith.mulf %43, %43 : vector<16x128xf32>
    %cst_23 = arith.constant dense<0.000000e+00> : vector<16xf32>
    %45 = vector.multi_reduction <add>, %44, %cst_23 [1] : vector<16x128xf32> to vector<16xf32>
    %46 = vector.shape_cast %45 : vector<16xf32> to vector<16x1xf32>
    %cst_24 = arith.constant 1.000000e-24 : f32
    %47 = vector.broadcast %cst_24 : f32 to vector<16x1xf32>
    %48 = arith.maximumf %46, %47 : vector<16x1xf32>
    %49 = math.rsqrt %48 : vector<16x1xf32>
    %50 = vector.broadcast %49 : vector<16x1xf32> to vector<16x128xf32>
    %51 = arith.mulf %43, %50 : vector<16x128xf32>
    %c0_25 = arith.constant 0 : index
    %c0_26 = arith.constant 0 : index
    %52 = vector.load %arg8[%c0_25, %c0_26] : memref<16x128xf32, #tpu.memory_space<vmem>>, vector<16x128xf32>
    tpu.vector_store %arg8[%c0_25, %c0_26], %51 {strides = array<i32>} : memref<16x128xf32, #tpu.memory_space<vmem>>, vector<16x128xf32>,
    return
  }
  func.func @transform_0(%arg0: i32) -> (i32, i32) {
    %c0_i32 = arith.constant 0 : i32
    %c0_i32_0 = arith.constant 0 : i32
    return %arg0, %c0_i32 : i32, i32
  }
  func.func @transform_1(%arg0: i32) -> (i32, i32) {
    %c0_i32 = arith.constant 0 : i32
    %c0_i32_0 = arith.constant 0 : i32
    %c0_i32_1 = arith.constant 0 : i32
    return %c0_i32, %c0_i32_0 : i32, i32
  }
  func.func @transform_2(%arg0: i32) -> (i32, i32) {
    %c0_i32 = arith.constant 0 : i32
    %c0_i32_0 = arith.constant 0 : i32
    %c0_i32_1 = arith.constant 0 : i32
    return %c0_i32, %c0_i32_0 : i32, i32
  }
  func.func @transform_3(%arg0: i32) -> (i32, i32) {
    %c0_i32 = arith.constant 0 : i32
    %c0_i32_0 = arith.constant 0 : i32
    %c0_i32_1 = arith.constant 0 : i32
    return %c0_i32, %c0_i32_0 : i32, i32
  }
  func.func @transform_4(%arg0: i32) -> (i32, i32) {
    %c0_i32 = arith.constant 0 : i32
    %c0_i32_0 = arith.constant 0 : i32
    %c0_i32_1 = arith.constant 0 : i32
    return %c0_i32, %c0_i32_0 : i32, i32
  }
  func.func @transform_5(%arg0: i32) -> (i32, i32) {
    %c0_i32 = arith.constant 0 : i32
    %c0_i32_0 = arith.constant 0 : i32
    %c0_i32_1 = arith.constant 0 : i32
    return %c0_i32, %c0_i32_0 : i32, i32
  }
  func.func @transform_6(%arg0: i32) -> (i32, i32) {
    %c0_i32 = arith.constant 0 : i32
    %c0_i32_0 = arith.constant 0 : i32
    %c0_i32_1 = arith.constant 0 : i32
    return %c0_i32, %c0_i32_0 : i32, i32
  }
  func.func @transform_7(%arg0: i32) -> (i32, i32) {
    %c0_i32 = arith.constant 0 : i32
    %c0_i32_0 = arith.constant 0 : i32
    return %arg0, %c0_i32 : i32, i32
  }
}

</mosaic_0001>

<bundles_post_ra>
// kernel: tpu_custom_call.1
= control target key start
LH: loop header
LB: loop body
LE: loop exit
PB: predicated region body
PF: predicated region fallthrough
CT: control target
= control target key end

     0   :  { %12 = vsyncpa [#allocation3], 0  ;;  %s3990_s0 = inlined_call_operand.hbm [shape: bf16[16,256], index: 0, kind: input, shape index: {}]   ;;  %s3991_s1 = inlined_call_operand.hbm [shape: bf16[256,512], index: 1, kind: input, shape index: {}]   ;;  %s3992_s2 = inlined_call_operand.hbm [shape: f32[1,512], index: 2, kind: input, shape index: {}]   ;;  %s3993_s3 = inlined_call_operand.hbm [shape: bf16[512,512], index: 3, kind: input, shape index: {}]   ;;  %s3994_s4 = inlined_call_operand.hbm [shape: f32[1,512], index: 4, kind: input, shape index: {}]   ;;  %s3995_s5 = inlined_call_operand.hbm [shape: bf16[512,128], index: 5, kind: input, shape index: {}]   ;;  %s3996_s6 = inlined_call_operand.vmem [shape: f32[1,128], index: 6, kind: input, shape index: {}]   ;;  %s3997_s7 = inlined_call_operand.hbm [shape: f32[16,128], index: 7, kind: output, shape index: {}]  }
   0x1   :  { %13 = vsyncpa [#allocation6], 0 }
   0x2   :  { %14 = vsyncpa [#allocation9], 0 }
   0x3   :  { %15 = vsyncpa [#allocation12], 0  ;;  %s34_s26 = sshll.u32 %s3991_s1, 4  ;;  %s35_s26 = int_to_ptr.hbm [resolvable:$true] %s34_s26 }
   0x4   :  { %16 = vsyncpa [#allocation4], 0  ;;  %s3733_s27 = smov [#allocation5]   ;;  %s58_s8 = sshll.u32 %s3993_s3, 4  ;;  %s59_s8 = int_to_ptr.hbm [resolvable:$true] %s58_s8 }
   0x5   :  { %s36_s28 = sshll.u32 %s3733_s27, 4  ;;  %s3734_s9 = smov 256   ;;  %s37_s28 = int_to_ptr.vmem [resolvable:$true] %s36_s28 }
   0x6   :  { %s3735_s10 = smov 16   ;;  %s3736_s11 = smov [#allocation8]  }
   0x7   :  { %42 = dma.hbm_to_vmem [thread:$0]  %s35_s26, 8192, %s37_s28, [#allocation6], %s3734_s9, %s3734_s9, %s3735_s10  }
   0x8   :  { %s60_s12 = sshll.u32 %s3736_s11, 4  ;;  %s21_s15 = sshll.u32 %s3990_s0, 4  ;;  %s61_s12 = int_to_ptr.vmem [resolvable:$true] %s60_s12  ;;  %s22_s15 = int_to_ptr.hbm [resolvable:$true] %s21_s15 }
   0x9   :  { %66 = dma.hbm_to_vmem [thread:$0]  %s59_s8, 16384, %s61_s12, [#allocation9], %s3734_s9, %s3734_s9, %s3735_s10  }
   0xa   :  { %s3737_s1 = smov [#allocation2]   ;;  %s48_s3 = sshll.u32 %s3992_s2, 4  ;;  %s49_s3 = int_to_ptr.hbm [resolvable:$true] %s48_s3 }
   0xb   :  { %s23_s16 = sshll.u32 %s3737_s1, 4  ;;  %s3738_s19 = smov 128   ;;  %s24_s16 = int_to_ptr.vmem [resolvable:$true] %s23_s16 }
   0xc   :  { %s3739_s20 = smov 8   ;;  %s3740_s21 = smov [#allocation7]  }
   0xd   :  { %29 = dma.hbm_to_vmem [thread:$0]  %s22_s15, 256, %s24_s16, [#allocation3], %s3738_s19, %s3738_s19, %s3739_s20  }
   0xe   :  { %s50_s22 = sshll.u32 %s3740_s21, 4  ;;  %s72_s24 = sshll.u32 %s3994_s4, 4  ;;  %s51_s22 = int_to_ptr.vmem [resolvable:$true] %s50_s22  ;;  %s73_s24 = int_to_ptr.hbm [resolvable:$true] %s72_s24 }
   0xf   :  { %53 = dma.hbm_to_vmem [thread:$0]  %s49_s3, 64, %s51_s22, [#allocation6]  }
  0x10   :  { %s82_s2 = sshll.u32 %s3995_s5, 4  ;;  %s3741_s27 = smov [#allocation10]   ;;  %s83_s2 = int_to_ptr.hbm [resolvable:$true] %s82_s2 }
  0x11   :  { %s74_s28 = sshll.u32 %s3741_s27, 4  ;;  %s3742_s29 = smov [#allocation11]   ;;  %s75_s28 = int_to_ptr.vmem [resolvable:$true] %s74_s28 }
  0x12   :  { %77 = dma.hbm_to_vmem [thread:$0]  %s73_s24, 64, %s75_s28, [#allocation9]  }
  0x13   :  { %s84_s30 = sshll.u32 %s3742_s29, 4  ;;  %s3743_s8 = smov 64   ;;  %s85_s30 = int_to_ptr.vmem [resolvable:$true] %s84_s30 }
  0x14   :  { %s3744_s9 = smov 4  }
  0x15   :  { %90 = dma.hbm_to_vmem [thread:$0]  %s83_s2, 4096, %s85_s30, [#allocation12], %s3743_s8, %s3743_s8, %s3744_s9  }
  0x16   :  { %3723 = dma.done.wait [#allocation3], 256  }
  0x17   :  { %3724 = vsyncadd [#allocation3], 4294967040 }
  0x18   :  { %3725 = dma.done.wait [#allocation6], 8256  }
  0x19   :  { %3726 = vsyncadd [#allocation6], 4294959040 }
  0x1a   :  { %3727 = dma.done.wait [#allocation9], 16448  }
  0x1b   :  { %3728 = vsyncadd [#allocation9], 4294950848 }
  0x1c   :  { %3729 = dma.done.wait [#allocation12], 4096  }
  0x1d   :  { %3730 = vsyncadd [#allocation12], 4294963200  ;;  %v2497_v0 = vld [vmem:[#allocation5 + $0xe0] sm:$0xf]  ;;  %v3311_v1 = vld [vmem:[#allocation5 + $0xec] sm:$0xf0] }
  0x1e   :  { %v2625_v2 = vld [vmem:[#allocation5 + $0x1e0] sm:$0xf]  ;;  %v2498_v3 = vor.u32 %v3311_v1, %v2497_v0  ;;  %v3343_v4 = vld [vmem:[#allocation5 + $0x1ec] sm:$0xf0]  ;;  %v3309_v5 = vld [vmem:[#allocation5 + $0xe4] sm:$0xf] }
  0x1f   :  { %v2499_v6 = vld [vmem:[#allocation5 + $0xf0] sm:$0xf0]  ;;  %v2626_v7 = vor.u32 %v3343_v4, %v2625_v2  ;;  %v3341_v9 = vld [vmem:[#allocation5 + $0x1e4] sm:$0xf]  ;;  %v2481_v11 = vld [vmem:[#allocation5 + $0xc0] sm:$0xf] }
  0x20   :  { %v2502_v8 = vor.u32 %v3309_v5, %v2499_v6  ;;  %v2627_v10 = vld [vmem:[#allocation5 + $0x1f0] sm:$0xf0]  ;;  %523 = vmatpush.bf16.msra.mxu0 %v2498_v3  ;;  %v3307_v13 = vld [vmem:[#allocation5 + $0xcc] sm:$0xf0]  ;;  %v2609_v14 = vld [vmem:[#allocation5 + $0x1c0] sm:$0xf] }
  0x21   :  { %v2630_v12 = vor.u32 %v3341_v9, %v2627_v10  ;;  %v3339_v15 = vld [vmem:[#allocation5 + $0x1cc] sm:$0xf0]  ;;  %537 = vmatpush.bf16.msra.mxu1 %v2626_v7  ;;  %v2482_v16 = vor.u32 %v3307_v13, %v2481_v11  ;;  %v3305_v18 = vld [vmem:[#allocation5 + $0xc4] sm:$0xf]  ;;  %v2483_v19 = vld [vmem:[#allocation5 + $0xd0] sm:$0xf0] }
  0x22   :  { %551 = vmatpush.bf16.msra.mxu2 %v2502_v8  ;;  %v2610_v17 = vor.u32 %v3339_v15, %v2609_v14  ;;  %v3337_v20 = vld [vmem:[#allocation5 + $0x1c4] sm:$0xf]  ;;  %v2486_v21 = vor.u32 %v3305_v18, %v2483_v19  ;;  %v2611_v22 = vld [vmem:[#allocation5 + $0x1d0] sm:$0xf0]  ;;  %v2465_v23 = vld [vmem:[#allocation5 + $0xa0] sm:$0xf] }
  0x23   :  { %565 = vmatpush.bf16.msra.mxu3 %v2630_v12  ;;  %v3303_v24 = vld [vmem:[#allocation5 + $0xac] sm:$0xf0]  ;;  %v2614_v25 = vor.u32 %v3337_v20, %v2611_v22  ;;  %v2593_v26 = vld [vmem:[#allocation5 + $0x1a0] sm:$0xf]  ;;  %v3301_v28 = vld [vmem:[#allocation5 + $0xa4] sm:$0xf] }
  0x24   :  { %v3335_v27 = vld [vmem:[#allocation5 + $0x1ac] sm:$0xf0]  ;;  %524 = vmatpush.bf16.msra.mxu0 %v2482_v16  ;;  %v2466_v29 = vor.u32 %v3303_v24, %v2465_v23  ;;  %v2467_v30 = vld [vmem:[#allocation5 + $0xb0] sm:$0xf0]  ;;  %v3333_v31 = vld [vmem:[#allocation5 + $0x1a4] sm:$0xf] }
  0x25   :  { %v2595_v32 = vld [vmem:[#allocation5 + $0x1b0] sm:$0xf0]  ;;  %538 = vmatpush.bf16.msra.mxu1 %v2610_v17  ;;  %v2594_v33 = vor.u32 %v3335_v27, %v2593_v26  ;;  %v2470_v34 = vor.u32 %v3301_v28, %v2467_v30  ;;  %v2449_v35 = vld [vmem:[#allocation5 + $0x80] sm:$0xf]  ;;  %v3299_v36 = vld [vmem:[#allocation5 + $0x8c] sm:$0xf0] }
  0x26   :  { %552 = vmatpush.bf16.msra.mxu2 %v2486_v21  ;;  %v2577_v37 = vld [vmem:[#allocation5 + $0x180] sm:$0xf]  ;;  %v2598_v38 = vor.u32 %v3333_v31, %v2595_v32  ;;  %v3331_v39 = vld [vmem:[#allocation5 + $0x18c] sm:$0xf0]  ;;  %v3297_v40 = vld [vmem:[#allocation5 + $0x84] sm:$0xf]  ;;  %v2450_v44 = vor.u32 %v3299_v36, %v2449_v35 }
  0x27   :  { %566 = vmatpush.bf16.msra.mxu3 %v2614_v25  ;;  %v2451_v41 = vld [vmem:[#allocation5 + $0x90] sm:$0xf0]  ;;  %v3329_v42 = vld [vmem:[#allocation5 + $0x184] sm:$0xf]  ;;  %v2578_v45 = vor.u32 %v3331_v39, %v2577_v37  ;;  %v2433_v47 = vld [vmem:[#allocation5 + $0x60] sm:$0xf] }
  0x28   :  { %v2579_v43 = vld [vmem:[#allocation5 + $0x190] sm:$0xf0]  ;;  %525 = vmatpush.bf16.msra.mxu0 %v2466_v29  ;;  %v2454_v46 = vor.u32 %v3297_v40, %v2451_v41  ;;  %v3295_v48 = vld [vmem:[#allocation5 + $0x6c] sm:$0xf0]  ;;  %v2561_v49 = vld [vmem:[#allocation5 + $0x160] sm:$0xf] }
  0x29   :  { %539 = vmatpush.bf16.msra.mxu1 %v2594_v33  ;;  %v2582_v50 = vor.u32 %v3329_v42, %v2579_v43  ;;  %v3327_v51 = vld [vmem:[#allocation5 + $0x16c] sm:$0xf0]  ;;  %v3293_v52 = vld [vmem:[#allocation5 + $0x64] sm:$0xf]  ;;  %v2435_v53 = vld [vmem:[#allocation5 + $0x70] sm:$0xf0]  ;;  %v2434_v56 = vor.u32 %v3295_v48, %v2433_v47 }
  0x2a   :  { %553 = vmatpush.bf16.msra.mxu2 %v2470_v34  ;;  %v3325_v54 = vld [vmem:[#allocation5 + $0x164] sm:$0xf]  ;;  %v2563_v55 = vld [vmem:[#allocation5 + $0x170] sm:$0xf0]  ;;  %v2562_v57 = vor.u32 %v3327_v51, %v2561_v49  ;;  %v2438_v58 = vor.u32 %v3293_v52, %v2435_v53  ;;  %v2417_v59 = vld [vmem:[#allocation5 + $0x40] sm:$0xf] }
  0x2b   :  { %567 = vmatpush.bf16.msra.mxu3 %v2598_v38  ;;  %v3291_v60 = vld [vmem:[#allocation5 + $0x4c] sm:$0xf0]  ;;  %v2545_v61 = vld [vmem:[#allocation5 + $0x140] sm:$0xf]  ;;  %v2566_v62 = vor.u32 %v3325_v54, %v2563_v55  ;;  %v3289_v0 = vld [vmem:[#allocation5 + $0x44] sm:$0xf] }
  0x2c   :  { %526 = vmatpush.bf16.msra.mxu0 %v2450_v44  ;;  %v3323_v63 = vld [vmem:[#allocation5 + $0x14c] sm:$0xf0]  ;;  %v2419_v1 = vld [vmem:[#allocation5 + $0x50] sm:$0xf0]  ;;  %v3321_v2 = vld [vmem:[#allocation5 + $0x144] sm:$0xf]  ;;  %v2418_v4 = vor.u32 %v3291_v60, %v2417_v59 }
  0x2d   :  { %540 = vmatpush.bf16.msra.mxu1 %v2578_v45  ;;  %v2547_v3 = vld [vmem:[#allocation5 + $0x150] sm:$0xf0]  ;;  %v2546_v5 = vor.u32 %v3323_v63, %v2545_v61  ;;  %v2422_v6 = vor.u32 %v3289_v0, %v2419_v1  ;;  %v2401_v7 = vld [vmem:[#allocation5 + $0x20] sm:$0xf]  ;;  %v3287_v8 = vld [vmem:[#allocation5 + $0x2c] sm:$0xf0] }
  0x2e   :  { %554 = vmatpush.bf16.msra.mxu2 %v2454_v46  ;;  %v2529_v9 = vld [vmem:[#allocation5 + $0x120] sm:$0xf]  ;;  %v2550_v10 = vor.u32 %v3321_v2, %v2547_v3  ;;  %v3319_v11 = vld [vmem:[#allocation5 + $0x12c] sm:$0xf0]  ;;  %v3285_v12 = vld [vmem:[#allocation5 + $0x24] sm:$0xf]  ;;  %v2402_v16 = vor.u32 %v3287_v8, %v2401_v7 }
  0x2f   :  { %568 = vmatpush.bf16.msra.mxu3 %v2582_v50  ;;  %v2403_v13 = vld [vmem:[#allocation5 + $0x30] sm:$0xf0]  ;;  %v3317_v14 = vld [vmem:[#allocation5 + $0x124] sm:$0xf]  ;;  %v2385_v17 = vld [vmem:[#allocation5] sm:$0xf]  ;;  %v2530_v20 = vor.u32 %v3319_v11, %v2529_v9 }
  0x30   :  { %527 = vmatpush.bf16.msra.mxu0 %v2434_v56  ;;  %v2531_v15 = vld [vmem:[#allocation5 + $0x130] sm:$0xf0]  ;;  %v3283_v18 = vld [vmem:[#allocation5 + $0xc] sm:$0xf0]  ;;  %v2513_v19 = vld [vmem:[#allocation5 + $0x100] sm:$0xf]  ;;  %v2406_v21 = vor.u32 %v3285_v12, %v2403_v13 }
  0x31   :  { %541 = vmatpush.bf16.msra.mxu1 %v2562_v57  ;;  %v3315_v22 = vld [vmem:[#allocation5 + $0x10c] sm:$0xf0]  ;;  %v3281_v23 = vld [vmem:[#allocation5 + $0x4] sm:$0xf]  ;;  %v2387_v24 = vld [vmem:[#allocation5 + $0x10] sm:$0xf0]  ;;  %v2534_v25 = vor.u32 %v3317_v14, %v2531_v15  ;;  %v2386_v32 = vor.u32 %v3283_v18, %v2385_v17 }
  0x32   :  { %555 = vmatpush.bf16.msra.mxu2 %v2438_v58  ;;  %v3313_v26 = vld [vmem:[#allocation5 + $0x104] sm:$0xf]  ;;  %v2515_v27 = vld [vmem:[#allocation5 + $0x110] sm:$0xf0]  ;;  %v2505_v28 = vld [vmem:[#allocation5 + $0xe8] sm:$0xf]  ;;  %v2514_v36 = vor.u32 %v3315_v22, %v2513_v19  ;;  %v2390_v37 = vor.u32 %v3281_v23, %v2387_v24 }
  0x33   :  { %569 = vmatpush.bf16.msra.mxu3 %v2566_v62  ;;  %v3312_v29 = vld [vmem:[#allocation5 + $0xf4] sm:$0xf0]  ;;  %v2633_v30 = vld [vmem:[#allocation5 + $0x1e8] sm:$0xf]  ;;  %v3310_v33 = vld [vmem:[#allocation5 + $0xec] sm:$0xf]  ;;  %v2518_v41 = vor.u32 %v3313_v26, %v2515_v27 }
  0x34   :  { %528 = vmatpush.bf16.msra.mxu0 %v2418_v4  ;;  %v3344_v31 = vld [vmem:[#allocation5 + $0x1f4] sm:$0xf0]  ;;  %v2507_v34 = vld [vmem:[#allocation5 + $0xf8] sm:$0xf0]  ;;  %v3342_v35 = vld [vmem:[#allocation5 + $0x1ec] sm:$0xf]  ;;  %v2506_v42 = vor.u32 %v3312_v29, %v2505_v28 }
  0x35   :  { %542 = vmatpush.bf16.msra.mxu1 %v2546_v5  ;;  %v2635_v38 = vld [vmem:[#allocation5 + $0x1f8] sm:$0xf0]  ;;  %v2377_v39 = vld [vmem:[#allocation2] sm:$0xf]  ;;  %v3280_v40 = vld [vmem:[#allocation2 + $0x4] sm:$0xf0]  ;;  %v2634_v45 = vor.u32 %v3344_v31, %v2633_v30  ;;  %v2510_v46 = vor.u32 %v3310_v33, %v2507_v34 }
  0x36   :  { %556 = vmatpush.bf16.msra.mxu2 %v2422_v6  ;;  %v3279_v43 = vld [vmem:[#allocation2 + $0x4] sm:$0xf]  ;;  %v2379_v44 = vld [vmem:[#allocation2 + $0x8] sm:$0xf0]  ;;  %v2489_v47 = vld [vmem:[#allocation5 + $0xc8] sm:$0xf]  ;;  %v2638_v50 = vor.u32 %v3342_v35, %v2635_v38  ;;  %v3807_v51 = vor.u32 %v3280_v40, %v2377_v39 }
  0x37   :  { %570 = vmatpush.bf16.msra.mxu3 %v2550_v10  ;;  %v3308_v48 = vld [vmem:[#allocation5 + $0xd4] sm:$0xf0]  ;;  %v2617_v49 = vld [vmem:[#allocation5 + $0x1c8] sm:$0xf]  ;;  %v3306_v53 = vld [vmem:[#allocation5 + $0xcc] sm:$0xf]  ;;  %v3809_v55 = vor.u32 %v3279_v43, %v2379_v44 }
  0x38   :  { %529 = vmatpush.bf16.msra.mxu0 %v2402_v16  ;;  %v3340_v52 = vld [vmem:[#allocation5 + $0x1d4] sm:$0xf0]  ;;  %v2491_v54 = vld [vmem:[#allocation5 + $0xd8] sm:$0xf0]  ;;  %v3338_v56 = vld [vmem:[#allocation5 + $0x1cc] sm:$0xf]  ;;  %v2490_v58 = vor.u32 %v3308_v48, %v2489_v47 }
  0x39   :  { %543 = vmatpush.bf16.msra.mxu1 %v2530_v20  ;;  %v2619_v57 = vld [vmem:[#allocation5 + $0x1d8] sm:$0xf0]  ;;  %v2618_v59 = vor.u32 %v3340_v52, %v2617_v49  ;;  %v2494_v60 = vor.u32 %v3306_v53, %v2491_v54  ;;  %v2473_v61 = vld [vmem:[#allocation5 + $0xa8] sm:$0xf]  ;;  %v3304_v62 = vld [vmem:[#allocation5 + $0xb4] sm:$0xf0] }
  0x3a   :  { %557 = vmatpush.bf16.msra.mxu2 %v2406_v21  ;;  %v2601_v63 = vld [vmem:[#allocation5 + $0x1a8] sm:$0xf]  ;;  %v2622_v0 = vor.u32 %v3338_v56, %v2619_v57  ;;  %v3336_v1 = vld [vmem:[#allocation5 + $0x1b4] sm:$0xf0]  ;;  %v3302_v2 = vld [vmem:[#allocation5 + $0xac] sm:$0xf]  ;;  %v2474_v6 = vor.u32 %v3304_v62, %v2473_v61 }
  0x3b   :  { %571 = vmatpush.bf16.msra.mxu3 %v2534_v25  ;;  %v2475_v3 = vld [vmem:[#allocation5 + $0xb8] sm:$0xf0]  ;;  %v3334_v4 = vld [vmem:[#allocation5 + $0x1ac] sm:$0xf]  ;;  %v2602_v7 = vor.u32 %v3336_v1, %v2601_v63  ;;  %v2457_v9 = vld [vmem:[#allocation5 + $0x88] sm:$0xf] }
  0x3c   :  { %530 = vmatpush.bf16.msra.mxu0 %v2386_v32  ;;  %v2603_v5 = vld [vmem:[#allocation5 + $0x1b8] sm:$0xf0]  ;;  %v2478_v8 = vor.u32 %v3302_v2, %v2475_v3  ;;  %v3300_v10 = vld [vmem:[#allocation5 + $0x94] sm:$0xf0]  ;;  %v2585_v11 = vld [vmem:[#allocation5 + $0x188] sm:$0xf] }
  0x3d   :  { %544 = vmatpush.bf16.msra.mxu1 %v2514_v36  ;;  %v2606_v12 = vor.u32 %v3334_v4, %v2603_v5  ;;  %v3332_v13 = vld [vmem:[#allocation5 + $0x194] sm:$0xf0]  ;;  %v3298_v14 = vld [vmem:[#allocation5 + $0x8c] sm:$0xf]  ;;  %v2459_v15 = vld [vmem:[#allocation5 + $0x98] sm:$0xf0]  ;;  %v2458_v18 = vor.u32 %v3300_v10, %v2457_v9 }
  0x3e   :  { %558 = vmatpush.bf16.msra.mxu2 %v2390_v37  ;;  %v3330_v16 = vld [vmem:[#allocation5 + $0x18c] sm:$0xf]  ;;  %v2587_v17 = vld [vmem:[#allocation5 + $0x198] sm:$0xf0]  ;;  %v2586_v19 = vor.u32 %v3332_v13, %v2585_v11  ;;  %v2462_v20 = vor.u32 %v3298_v14, %v2459_v15  ;;  %v2441_v21 = vld [vmem:[#allocation5 + $0x68] sm:$0xf] }
  0x3f   :  { %572 = vmatpush.bf16.msra.mxu3 %v2518_v41  ;;  %531 = vmatmul.bf16.vlgmr.msra.gmra.mxu0 %v3807_v51  ;;  %v3296_v22 = vld [vmem:[#allocation5 + $0x74] sm:$0xf0]  ;;  %v2569_v23 = vld [vmem:[#allocation5 + $0x168] sm:$0xf]  ;;  %v2590_v24 = vor.u32 %v3330_v16, %v2587_v17  ;;  %v3294_v26 = vld [vmem:[#allocation5 + $0x6c] sm:$0xf] }
  0x40   :  { %579 = vmatpush.bf16.msrb.mxu0 %v2506_v42  ;;  %545 = vmatmul.bf16.vlgmr.msra.gmra.mxu1 %v3809_v55  ;;  %v3328_v25 = vld [vmem:[#allocation5 + $0x174] sm:$0xf0]  ;;  %v2443_v27 = vld [vmem:[#allocation5 + $0x78] sm:$0xf0]  ;;  %v3326_v28 = vld [vmem:[#allocation5 + $0x16c] sm:$0xf]  ;;  %v2442_v30 = vor.u32 %v3296_v22, %v2441_v21 }
  0x41   :  { %593 = vmatpush.bf16.msrb.mxu1 %v2634_v45  ;;  %559 = vmatmul.bf16.vlgmr.msra.gmra.mxu2 %v3807_v51  ;;  %v2571_v29 = vld [vmem:[#allocation5 + $0x178] sm:$0xf0]  ;;  %v2570_v31 = vor.u32 %v3328_v25, %v2569_v23  ;;  %v2446_v32 = vor.u32 %v3294_v26, %v2443_v27  ;;  %v2425_v33 = vld [vmem:[#allocation5 + $0x48] sm:$0xf]  ;;  %v3292_v34 = vld [vmem:[#allocation5 + $0x54] sm:$0xf0] }
  0x42   :  { %607 = vmatpush.bf16.msrb.mxu2 %v2510_v46  ;;  %573 = vmatmul.bf16.vlgmr.msra.gmra.mxu3 %v3809_v55  ;;  %v2553_v35 = vld [vmem:[#allocation5 + $0x148] sm:$0xf]  ;;  %v2574_v36 = vor.u32 %v3326_v28, %v2571_v29  ;;  %v3324_v37 = vld [vmem:[#allocation5 + $0x154] sm:$0xf0]  ;;  %v3290_v38 = vld [vmem:[#allocation5 + $0x4c] sm:$0xf]  ;;  %v2426_v42 = vor.u32 %v3292_v34, %v2425_v33 }
  0x43   :  { %621 = vmatpush.bf16.msrb.mxu3 %v2638_v50  ;;  %v2427_v39 = vld [vmem:[#allocation5 + $0x58] sm:$0xf0]  ;;  %v3322_v40 = vld [vmem:[#allocation5 + $0x14c] sm:$0xf]  ;;  %v2554_v43 = vor.u32 %v3324_v37, %v2553_v35  ;;  %v2409_v45 = vld [vmem:[#allocation5 + $0x28] sm:$0xf] }
  0x44   :  { %580 = vmatpush.bf16.msrb.mxu0 %v2490_v58  ;;  %v2555_v41 = vld [vmem:[#allocation5 + $0x158] sm:$0xf0]  ;;  %v2430_v44 = vor.u32 %v3290_v38, %v2427_v39  ;;  %v3288_v46 = vld [vmem:[#allocation5 + $0x34] sm:$0xf0]  ;;  %v2537_v47 = vld [vmem:[#allocation5 + $0x128] sm:$0xf] }
  0x45   :  { %594 = vmatpush.bf16.msrb.mxu1 %v2618_v59  ;;  %v2558_v48 = vor.u32 %v3322_v40, %v2555_v41  ;;  %v3320_v49 = vld [vmem:[#allocation5 + $0x134] sm:$0xf0]  ;;  %v3286_v50 = vld [vmem:[#allocation5 + $0x2c] sm:$0xf]  ;;  %v2411_v52 = vld [vmem:[#allocation5 + $0x38] sm:$0xf0]  ;;  %v2410_v56 = vor.u32 %v3288_v46, %v2409_v45 }
  0x46   :  { %608 = vmatpush.bf16.msrb.mxu2 %v2494_v60  ;;  %v3318_v53 = vld [vmem:[#allocation5 + $0x12c] sm:$0xf]  ;;  %v2539_v54 = vld [vmem:[#allocation5 + $0x138] sm:$0xf0]  ;;  %v2538_v57 = vor.u32 %v3320_v49, %v2537_v47  ;;  %v2414_v58 = vor.u32 %v3286_v50, %v2411_v52  ;;  %v2393_v59 = vld [vmem:[#allocation5 + $0x8] sm:$0xf] }
  0x47   :  { %622 = vmatpush.bf16.msrb.mxu3 %v2622_v0  ;;  %v3284_v60 = vld [vmem:[#allocation5 + $0x14] sm:$0xf0]  ;;  %v2521_v61 = vld [vmem:[#allocation5 + $0x108] sm:$0xf]  ;;  %v2542_v62 = vor.u32 %v3318_v53, %v2539_v54  ;;  %v3282_v0 = vld [vmem:[#allocation5 + $0xc] sm:$0xf] }
  0x48   :  { %581 = vmatpush.bf16.msrb.mxu0 %v2474_v6  ;;  %v3316_v63 = vld [vmem:[#allocation5 + $0x114] sm:$0xf0]  ;;  %v2395_v1 = vld [vmem:[#allocation5 + $0x18] sm:$0xf0]  ;;  %v3314_v2 = vld [vmem:[#allocation5 + $0x10c] sm:$0xf]  ;;  %v2394_v4 = vor.u32 %v3284_v60, %v2393_v59 }
  0x49   :  { %595 = vmatpush.bf16.msrb.mxu1 %v2602_v7  ;;  %v2523_v3 = vld [vmem:[#allocation5 + $0x118] sm:$0xf0]  ;;  %v2522_v5 = vor.u32 %v3316_v63, %v2521_v61  ;;  %v2398_v6 = vor.u32 %v3282_v0, %v2395_v1  ;;  %v3375_v9 = vld [vmem:[#allocation8 + $0xec] sm:$0xf0]  ;;  %v2881_v10 = vld [vmem:[#allocation8 + $0x1e0] sm:$0xf] }
  0x4a   :  { %609 = vmatpush.bf16.msrb.mxu2 %v2478_v8  ;;  %v2526_v7 = vor.u32 %v3314_v2, %v2523_v3  ;;  %v2753_v8 = vld [vmem:[#allocation8 + $0xe0] sm:$0xf]  ;;  %v3371_v15 = vld [vmem:[#allocation8 + $0xcc] sm:$0xf0]  ;;  %s2359_s13 = sshll.u32 %s3997_s7, 4  ;;  %s2360_s13 = int_to_ptr.hbm [resolvable:$true] %s2359_s13 }
  0x4b   :  { %623 = vmatpush.bf16.msrb.mxu3 %v2606_v12  ;;  %v2754_v11 = vor.u32 %v3375_v9, %v2753_v8  ;;  %v3407_v12 = vld [vmem:[#allocation8 + $0x1ec] sm:$0xf0]  ;;  %v2737_v14 = vld [vmem:[#allocation8 + $0xc0] sm:$0xf] }
  0x4c   :  { %582 = vmatpush.bf16.msrb.mxu0 %v2458_v18  ;;  %v2882_v13 = vor.u32 %v3407_v12, %v2881_v10  ;;  %v2865_v16 = vld [vmem:[#allocation8 + $0x1c0] sm:$0xf]  ;;  %v2738_v17 = vor.u32 %v3371_v15, %v2737_v14  ;;  %v3403_v18 = vld [vmem:[#allocation8 + $0x1cc] sm:$0xf0]  ;;  %v3373_v14 = vld [vmem:[#allocation8 + $0xe4] sm:$0xf] }
  0x4d   :  { %596 = vmatpush.bf16.msrb.mxu1 %v2586_v19  ;;  %v2866_v19 = vor.u32 %v3403_v18, %v2865_v16  ;;  %v2849_v21 = vld [vmem:[#allocation8 + $0x1a0] sm:$0xf]  ;;  %v3399_v22 = vld [vmem:[#allocation8 + $0x1ac] sm:$0xf0]  ;;  %v2755_v18 = vld [vmem:[#allocation8 + $0xf0] sm:$0xf0] }
  0x4e   :  { %610 = vmatpush.bf16.msrb.mxu2 %v2462_v20  ;;  %v2721_v20 = vld [vmem:[#allocation8 + $0xa0] sm:$0xf]  ;;  %v2850_v23 = vor.u32 %v3399_v22, %v2849_v21  ;;  %v3363_v26 = vld [vmem:[#allocation8 + $0x8c] sm:$0xf0] }
  0x4f   :  { %624 = vmatpush.bf16.msrb.mxu3 %v2590_v24  ;;  %v3819_v24 = vld [vmem:[#allocation7] sm:$0xf]  ;;  %v2705_v25 = vld [vmem:[#allocation8 + $0x80] sm:$0xf]  ;;  %v3395_v29 = vld [vmem:[#allocation8 + $0x18c] sm:$0xf0] }
  0x50   :  { %583 = vmatpush.bf16.msrb.mxu0 %v2442_v30  ;;  %v2833_v27 = vld [vmem:[#allocation8 + $0x180] sm:$0xf]  ;;  %v2706_v28 = vor.u32 %v3363_v26, %v2705_v25  ;;  %v3359_v33 = vld [vmem:[#allocation8 + $0x6c] sm:$0xf0]  ;;  %v186_v39 = vperm.slane %v3819_v24, 1 }
  0x51   :  { %597 = vmatpush.bf16.msrb.mxu1 %v2570_v31  ;;  %v2834_v30 = vor.u32 %v3395_v29, %v2833_v27  ;;  %v185_v31 = vperm.slane %v3819_v24, 0  ;;  %v2817_v34 = vld [vmem:[#allocation8 + $0x160] sm:$0xf]  ;;  %v3387_v46 = vld [vmem:[#allocation8 + $0x14c] sm:$0xf0] }
  0x52   :  { %611 = vmatpush.bf16.msrb.mxu2 %v2446_v32  ;;  %v2689_v32 = vld [vmem:[#allocation8 + $0x60] sm:$0xf]  ;;  %v3351_v54 = vld [vmem:[#allocation8 + $0x2c] sm:$0xf0] }
  0x53   :  { %625 = vmatpush.bf16.msrb.mxu3 %v2574_v36  ;;  %v2690_v35 = vor.u32 %v3359_v33, %v2689_v32  ;;  %v3391_v36 = vld [vmem:[#allocation8 + $0x16c] sm:$0xf0]  ;;  %v2657_v53 = vld [vmem:[#allocation8 + $0x20] sm:$0xf]  ;;  %v3369_v33 = vld [vmem:[#allocation8 + $0xc4] sm:$0xf] }
  0x54   :  { %584 = vmatpush.bf16.msrb.mxu0 %v2426_v42  ;;  %v2818_v38 = vor.u32 %v3391_v36, %v2817_v34  ;;  %v2673_v42 = vld [vmem:[#allocation8 + $0x40] sm:$0xf]  ;;  %v3347_v2 = vld [vmem:[#allocation8 + $0xc] sm:$0xf0]  ;;  %v2739_v34 = vld [vmem:[#allocation8 + $0xd0] sm:$0xf0] }
  0x55   :  { %598 = vmatpush.bf16.msrb.mxu1 %v2554_v43  ;;  %v3355_v43 = vld [vmem:[#allocation8 + $0x4c] sm:$0xf0]  ;;  %v2641_v1 = vld [vmem:[#allocation8] sm:$0xf]  ;;  %v2742_v36 = vor.u32 %v3369_v33, %v2739_v34 }
  0x56   :  { %612 = vmatpush.bf16.msrb.mxu2 %v2430_v44  ;;  %v2801_v44 = vld [vmem:[#allocation8 + $0x140] sm:$0xf]  ;;  %v2674_v45 = vor.u32 %v3355_v43, %v2673_v42  ;;  %v3435_v27 = vld [vmem:[#allocation8 + $0x2cc] sm:$0xf0] }
  0x57   :  { %626 = vmatpush.bf16.msrb.mxu3 %v2558_v48  ;;  %v2802_v47 = vor.u32 %v3387_v46, %v2801_v44  ;;  %v2769_v3 = vld [vmem:[#allocation8 + $0x100] sm:$0xf]  ;;  %v3467_v32 = vld [vmem:[#allocation8 + $0x3cc] sm:$0xf0] }
  0x58   :  { %585 = vmatpush.bf16.msrb.mxu0 %v2410_v56  ;;  %v2785_v56 = vld [vmem:[#allocation8 + $0x120] sm:$0xf]  ;;  %v3431_v44 = vld [vmem:[#allocation8 + $0x2ac] sm:$0xf0] }
  0x59   :  { %599 = vmatpush.bf16.msrb.mxu1 %v2538_v57  ;;  %v2658_v57 = vor.u32 %v3351_v54, %v2657_v53  ;;  %v3137_v12 = vld [vmem:[#allocation8 + $0x3e0] sm:$0xf]  ;;  %v2723_v53 = vld [vmem:[#allocation8 + $0xb0] sm:$0xf0] }
  0x5a   :  { %613 = vmatpush.bf16.msrb.mxu2 %v2414_v58  ;;  %v3383_v58 = vld [vmem:[#allocation8 + $0x12c] sm:$0xf0]  ;;  %v2993_v26 = vld [vmem:[#allocation8 + $0x2c0] sm:$0xf] }
  0x5b   :  { %627 = vmatpush.bf16.msrb.mxu3 %v2542_v62  ;;  %v2786_v61 = vor.u32 %v3383_v58, %v2785_v56  ;;  %v2977_v43 = vld [vmem:[#allocation8 + $0x2a0] sm:$0xf]  ;;  %v3397_v58 = vld [vmem:[#allocation8 + $0x1a4] sm:$0xf] }
  0x5c   :  { %586 = vmatpush.bf16.msrb.mxu0 %v2394_v4  ;;  %v2642_v4 = vor.u32 %v3347_v2, %v2641_v1  ;;  %v2978_v54 = vor.u32 %v3431_v44, %v2977_v43  ;;  %v3427_v1 = vld [vmem:[#allocation8 + $0x28c] sm:$0xf0]  ;;  %v3089_v2 = vld [vmem:[#allocation8 + $0x380] sm:$0xf] }
  0x5d   :  { %600 = vmatpush.bf16.msrb.mxu1 %v2522_v5  ;;  %v3379_v5 = vld [vmem:[#allocation8 + $0x10c] sm:$0xf0]  ;;  %v3057_v43 = vld [vmem:[#allocation8 + $0x340] sm:$0xf] }
  0x5e   :  { %614 = vmatpush.bf16.msrb.mxu2 %v2398_v6  ;;  %v3009_v6 = vld [vmem:[#allocation8 + $0x2e0] sm:$0xf]  ;;  %v2770_v10 = vor.u32 %v3379_v5, %v2769_v3 }
  0x5f   :  { %628 = vmatpush.bf16.msrb.mxu3 %v2526_v7  ;;  %587 = vmatmul.bf16.vlgmr.msrb.gmra.mxu0 %v3807_v51  ;;  %v3439_v7 = vld [vmem:[#allocation8 + $0x2ec] sm:$0xf0] }
  0x60   :  { %601 = vmatmul.bf16.vlgmr.msrb.gmra.mxu1 %v3809_v55  ;;  %1597 = vmatpush.bf16.msra.mxu0 %v2754_v11  ;;  %v3010_v11 = vor.u32 %v3439_v7, %v3009_v6  ;;  %v3459_v7 = vld [vmem:[#allocation8 + $0x38c] sm:$0xf0] }
  0x61   :  { %615 = vmatmul.bf16.vlgmr.msrb.gmra.mxu2 %v3807_v51  ;;  %1611 = vmatpush.bf16.msra.mxu1 %v2882_v13  ;;  %v3367_v51 = vld [vmem:[#allocation8 + $0xac] sm:$0xf0] }
  0x62   :  { %629 = vmatmul.bf16.vlgmr.msrb.gmra.mxu3 %v3809_v55  ;;  %v2722_v55 = vor.u32 %v3367_v51, %v2721_v20  ;;  %v3471_v13 = vld [vmem:[#allocation8 + $0x3ec] sm:$0xf0]  ;;  %v2883_v20 = vld [vmem:[#allocation8 + $0x1f0] sm:$0xf0]  ;;  %1625 = vmatpush.bf16.msra.mxu2 %v3010_v11 }
  0x63   :  { %v2707_v11 = vld [vmem:[#allocation8 + $0x90] sm:$0xf0] }
  0x64   :  { %1598 = vmatpush.bf16.msra.mxu0 %v2738_v17  ;;  %v3138_v17 = vor.u32 %v3471_v13, %v3137_v12  ;;  %v3090_v12 = vor.u32 %v3459_v7, %v3089_v2 }
  0x65   :  { %1612 = vmatpush.bf16.msra.mxu1 %v2866_v19  ;;  %v3405_v19 = vld [vmem:[#allocation8 + $0x1e4] sm:$0xf] }
  0x66   :  { %1639 = vmatpush.bf16.msra.mxu3 %v3138_v17  ;;  %v2886_v25 = vor.u32 %v3405_v19, %v2883_v20 }
  0x68   :  { %1599 = vmatpush.bf16.msra.mxu0 %v2722_v55 }
  0x69   :  { %1613 = vmatpush.bf16.msra.mxu1 %v2850_v23  ;;  %v2758_v23 = vor.u32 %v3373_v14, %v2755_v18  ;;  %v3393_v14 = vld [vmem:[#allocation8 + $0x184] sm:$0xf] }
  0x6c   :  { %1600 = vmatpush.bf16.msra.mxu0 %v2706_v28  ;;  %v3121_v28 = vld [vmem:[#allocation8 + $0x3c0] sm:$0xf] }
  0x6d   :  { %1614 = vmatpush.bf16.msra.mxu1 %v2834_v30 }
  0x70   :  { %1601 = vmatpush.bf16.msra.mxu0 %v2690_v35  ;;  %v3122_v35 = vor.u32 %v3467_v32, %v3121_v28  ;;  %v3455_v28 = vld [vmem:[#allocation8 + $0x36c] sm:$0xf0]  ;;  %v188_v32 = vperm.slane %v3819_v24, 3 }
  0x71   :  { %1615 = vmatpush.bf16.msra.mxu1 %v2818_v38  ;;  %v2867_v38 = vld [vmem:[#allocation8 + $0x1d0] sm:$0xf0] }
  0x72   :  { %1640 = vmatpush.bf16.msra.mxu3 %v3122_v35  ;;  %v3389_v35 = vld [vmem:[#allocation8 + $0x164] sm:$0xf] }
  0x74   :  { %1602 = vmatpush.bf16.msra.mxu0 %v2674_v45  ;;  %v3105_v45 = vld [vmem:[#allocation8 + $0x3a0] sm:$0xf] }
  0x75   :  { %1616 = vmatpush.bf16.msra.mxu1 %v2802_v47 }
  0x78   :  { %1603 = vmatpush.bf16.msra.mxu0 %v2658_v57 }
  0x79   :  { %1617 = vmatpush.bf16.msra.mxu1 %v2786_v61 }
  0x7c   :  { %1604 = vmatpush.bf16.msra.mxu0 %v2642_v4 }
  0x7d   :  { %1618 = vmatpush.bf16.msra.mxu1 %v2770_v10  ;;  %v3361_v10 = vld [vmem:[#allocation8 + $0x84] sm:$0xf] }
  0x7e   :  { %v2710_v13 = vor.u32 %v3361_v10, %v2707_v11 }
  0x80   :  { %1653 = vmatpush.bf16.msrb.mxu0 %v2758_v23 }
  0x81   :  { %1667 = vmatpush.bf16.msrb.mxu1 %v2886_v25 }
  0x84   :  { %1654 = vmatpush.bf16.msrb.mxu0 %v2742_v36  ;;  %v2819_v36 = vld [vmem:[#allocation8 + $0x170] sm:$0xf0] }
  0xbc   :  { %v532_v37 = vpop.f32.mrf.mxu0 }
  0xbd   :  { %v546_v40 = vpop.f32.mrf.mxu1  ;;  %v533_v41 = vadd.f32 %v532_v37, %v185_v31  ;;  %v3401_v37 = vld [vmem:[#allocation8 + $0x1c4] sm:$0xf] }
  0xbe   :  { %v2870_v42 = vor.u32 %v3401_v37, %v2867_v38 }
  0xbf   :  { %v547_v50 = vadd.f32 %v546_v40, %v533_v41 }
  0xc0   :  { %1668 = vmatpush.bf16.msrb.mxu1 %v2870_v42  ;;  %v3419_v42 = vld [vmem:[#allocation8 + $0x24c] sm:$0xf0] }
  0xc4   :  { %v560_v48 = vpop.f32.mrf.mxu2  ;;  %v534_v60 = vpop.f32.mrf.mxu0 }
  0xc5   :  { %v561_v49 = vadd.f32 %v560_v48, %v186_v39  ;;  %v574_v52 = vpop.f32.mrf.mxu3  ;;  %v535_v62 = vadd.f32 %v534_v60, %v185_v31  ;;  %v548_v0 = vpop.f32.mrf.mxu1  ;;  %v2994_v31 = vor.u32 %v3435_v27, %v2993_v26 }
  0xc7   :  { %v575_v59 = vadd.f32 %v574_v52, %v561_v49  ;;  %v549_v16 = vadd.f32 %v548_v0, %v535_v62  ;;  %1626 = vmatpush.bf16.msra.mxu2 %v2994_v31  ;;  %v3365_v52 = vld [vmem:[#allocation8 + $0xa4] sm:$0xf]  ;;  %v2961_v0 = vld [vmem:[#allocation8 + $0x280] sm:$0xf]  ;;  %v187_v31 = vperm.slane %v3819_v24, 2 }
  0xc8   :  { %v2726_v57 = vor.u32 %v3365_v52, %v2723_v53  ;;  %v2962_v6 = vor.u32 %v3427_v1, %v2961_v0  ;;  %v3353_v52 = vld [vmem:[#allocation8 + $0x44] sm:$0xf]  ;;  %v2675_v53 = vld [vmem:[#allocation8 + $0x50] sm:$0xf0] }
  0xc9   :  { %v635_v63 = vpack.c.bf16 %v575_v59, %v547_v50  ;;  %v3463_v50 = vld [vmem:[#allocation8 + $0x3ac] sm:$0xf0]  ;;  %v2851_v59 = vld [vmem:[#allocation8 + $0x1b0] sm:$0xf0] }
  0xca   :  { %v3106_v56 = vor.u32 %v3463_v50, %v3105_v45  ;;  %1655 = vmatpush.bf16.msrb.mxu0 %v2726_v57  ;;  %v3451_v50 = vld [vmem:[#allocation8 + $0x34c] sm:$0xf0] }
  0xcb   :  { %v3823_v8 = vunpack.c.l.bf16 %v635_v63  ;;  %v3825_v9 = vunpack.c.h.bf16 %v635_v63  ;;  %v2854_v63 = vor.u32 %v3397_v58, %v2851_v59  ;;  %1627 = vmatpush.bf16.msra.mxu2 %v2978_v54  ;;  %v3058_v57 = vor.u32 %v3451_v50, %v3057_v43  ;;  %v3385_v59 = vld [vmem:[#allocation8 + $0x144] sm:$0xf] }
  0xcc   :  { %v562_v15 = vpop.f32.mrf.mxu2  ;;  %1641 = vmatpush.bf16.msra.mxu3 %v3106_v56  ;;  %v2678_v58 = vor.u32 %v3353_v52, %v2675_v53 }
  0xcd   :  { %v659_v51 = vmul.f32 0.044677734, %v3823_v8  ;;  %v660_v21 = vmul.f32 0.044677734, %v3825_v9  ;;  %v563_v55 = vadd.f32 %v562_v15, %v186_v39  ;;  %v576_v22 = vpop.f32.mrf.mxu3  ;;  %1669 = vmatpush.bf16.msrb.mxu1 %v2854_v63  ;;  %v2835_v15 = vld [vmem:[#allocation8 + $0x190] sm:$0xf0] }
  0xce   :  { %v2838_v20 = vor.u32 %v3393_v14, %v2835_v15  ;;  %1656 = vmatpush.bf16.msrb.mxu0 %v2710_v13  ;;  %v3447_v13 = vld [vmem:[#allocation8 + $0x32c] sm:$0xf0]  ;;  %v3349_v14 = vld [vmem:[#allocation8 + $0x24] sm:$0xf]  ;;  %v2659_v15 = vld [vmem:[#allocation8 + $0x30] sm:$0xf0] }
  0xcf   :  { %v667_v29 = vpack.c.bf16 %v660_v21, %v659_v51  ;;  %v577_v30 = vadd.f32 %v576_v22, %v563_v55  ;;  %1628 = vmatpush.bf16.msra.mxu2 %v2962_v6  ;;  %v2945_v51 = vld [vmem:[#allocation8 + $0x260] sm:$0xf]  ;;  %v3423_v21 = vld [vmem:[#allocation8 + $0x26c] sm:$0xf0] }
  0xd0   :  { %1642 = vmatpush.bf16.msra.mxu3 %v3090_v12  ;;  %v3073_v55 = vld [vmem:[#allocation8 + $0x360] sm:$0xf]  ;;  %v2946_v27 = vor.u32 %v3423_v21, %v2945_v51  ;;  %v2787_v51 = vld [vmem:[#allocation8 + $0x130] sm:$0xf0] }
  0xd1   :  { %v671_v39 = vunpack.c.l.bf16 %v667_v29  ;;  %v672_v40 = vunpack.c.h.bf16 %v667_v29  ;;  %v637_v41 = vpack.c.bf16 %v577_v30, %v549_v16  ;;  %v3357_v29 = vld [vmem:[#allocation8 + $0x64] sm:$0xf]  ;;  %v2691_v30 = vld [vmem:[#allocation8 + $0x70] sm:$0xf0]  ;;  %1670 = vmatpush.bf16.msrb.mxu1 %v2838_v20  ;;  %v3074_v33 = vor.u32 %v3455_v28, %v3073_v55  ;;  %v2897_v28 = vld [vmem:[#allocation8 + $0x200] sm:$0xf] }
  0xd2   :  { %v2694_v34 = vor.u32 %v3357_v29, %v2691_v30  ;;  %v3381_v20 = vld [vmem:[#allocation8 + $0x124] sm:$0xf]  ;;  %v3411_v29 = vld [vmem:[#allocation8 + $0x20c] sm:$0xf0]  ;;  %v3025_v30 = vld [vmem:[#allocation8 + $0x300] sm:$0xf] }
  0xd3   :  { %v679_v46 = vmul.f32 %v671_v39, %v3823_v8  ;;  %v680_v47 = vmul.f32 %v672_v40, %v3825_v9  ;;  %v3831_v48 = vunpack.c.l.bf16 %v637_v41  ;;  %v3833_v49 = vunpack.c.h.bf16 %v637_v41  ;;  %1629 = vmatpush.bf16.msra.mxu2 %v2946_v27  ;;  %v2929_v41 = vld [vmem:[#allocation8 + $0x240] sm:$0xf] }
  0xd4   :  { %v2822_v40 = vor.u32 %v3389_v35, %v2819_v36  ;;  %1643 = vmatpush.bf16.msra.mxu3 %v3074_v33  ;;  %1657 = vmatpush.bf16.msrb.mxu0 %v2694_v34  ;;  %v2930_v56 = vor.u32 %v3419_v42, %v2929_v41  ;;  %v2790_v27 = vor.u32 %v3381_v20, %v2787_v51  ;;  %v2979_v20 = vld [vmem:[#allocation8 + $0x2b0] sm:$0xf0]  ;;  %v3461_v51 = vld [vmem:[#allocation8 + $0x3a4] sm:$0xf] }
  0xd5   :  { %v687_v60 = vpack.c.bf16 %v680_v47, %v679_v46  ;;  %v663_v61 = vmul.f32 0.044677734, %v3831_v48  ;;  %v664_v62 = vmul.f32 0.044677734, %v3833_v49  ;;  %v2898_v36 = vor.u32 %v3411_v29, %v2897_v28 }
  0xd6   :  { %1671 = vmatpush.bf16.msrb.mxu1 %v2822_v40 }
  0xd7   :  { %v691_v3 = vunpack.c.l.bf16 %v687_v60  ;;  %v692_v4 = vunpack.c.h.bf16 %v687_v60  ;;  %v669_v5 = vpack.c.bf16 %v664_v62, %v663_v61  ;;  %v2803_v60 = vld [vmem:[#allocation8 + $0x150] sm:$0xf0]  ;;  %1630 = vmatpush.bf16.msra.mxu2 %v2930_v56  ;;  %v3469_v56 = vld [vmem:[#allocation8 + $0x3e4] sm:$0xf] }
  0xd8   :  { %v2806_v0 = vor.u32 %v3385_v59, %v2803_v60  ;;  %1644 = vmatpush.bf16.msra.mxu3 %v3058_v57  ;;  %1658 = vmatpush.bf16.msrb.mxu0 %v2678_v58  ;;  %v3139_v57 = vld [vmem:[#allocation8 + $0x3f0] sm:$0xf0] }
  0xd9   :  { %v699_v16 = vmul.f32 %v691_v3, %v3823_v8  ;;  %v700_v17 = vmul.f32 %v692_v4, %v3825_v9  ;;  %v675_v18 = vunpack.c.l.bf16 %v669_v5  ;;  %v676_v19 = vunpack.c.h.bf16 %v669_v5  ;;  %v2913_v3 = vld [vmem:[#allocation8 + $0x220] sm:$0xf]  ;;  %v3415_v4 = vld [vmem:[#allocation8 + $0x22c] sm:$0xf0] }
  0xda   :  { %v3041_v5 = vld [vmem:[#allocation8 + $0x320] sm:$0xf]  ;;  %1672 = vmatpush.bf16.msrb.mxu1 %v2806_v0 }
  0xdb   :  { %v707_v22 = vpack.c.bf16 %v700_v17, %v699_v16  ;;  %v683_v23 = vmul.f32 %v675_v18, %v3831_v48  ;;  %v684_v25 = vmul.f32 %v676_v19, %v3833_v49  ;;  %v2914_v17 = vor.u32 %v3415_v4, %v2913_v3 }
  0xdc   :  { %v588_v26 = vpop.f32.mrf.mxu0  ;;  %v3042_v18 = vor.u32 %v3447_v13, %v3041_v5  ;;  %v2662_v19 = vor.u32 %v3349_v14, %v2659_v15  ;;  %v3864_v14 = vmul.f32 0.5, %v3823_v8 }
  0xdd   :  { %v711_v37 = vunpack.c.l.bf16 %v707_v22  ;;  %v712_v38 = vunpack.c.h.bf16 %v707_v22  ;;  %v689_v39 = vpack.c.bf16 %v684_v25, %v683_v23  ;;  %v589_v54 = vadd.f32 %v588_v26, %v187_v31  ;;  %v602_v1 = vpop.f32.mrf.mxu1  ;;  %1631 = vmatpush.bf16.msra.mxu2 %v2914_v17  ;;  %v3429_v17 = vld [vmem:[#allocation8 + $0x2a4] sm:$0xf] }
  0xde   :  { %1645 = vmatpush.bf16.msra.mxu3 %v3042_v18  ;;  %1659 = vmatpush.bf16.msrb.mxu0 %v2662_v19 }
  0xdf   :  { %v719_v44 = vadd.f32 %v711_v37, %v3823_v8  ;;  %v720_v45 = vadd.f32 %v712_v38, %v3825_v9  ;;  %v695_v46 = vunpack.c.l.bf16 %v689_v39  ;;  %v696_v47 = vunpack.c.h.bf16 %v689_v39  ;;  %v3443_v37 = vld [vmem:[#allocation8 + $0x30c] sm:$0xf0]  ;;  %v3345_v38 = vld [vmem:[#allocation8 + $0x4] sm:$0xf]  ;;  %v2643_v39 = vld [vmem:[#allocation8 + $0x10] sm:$0xf0]  ;;  %1673 = vmatpush.bf16.msrb.mxu1 %v2790_v27 }
  0xe0   :  { %v603_v16 = vadd.f32 %v602_v1, %v589_v54  ;;  %v3026_v42 = vor.u32 %v3443_v37, %v3025_v30  ;;  %v2646_v43 = vor.u32 %v3345_v38, %v2643_v39  ;;  %v3011_v54 = vld [vmem:[#allocation8 + $0x2f0] sm:$0xf0]  ;;  %v3433_v1 = vld [vmem:[#allocation8 + $0x2c4] sm:$0xf] }
  0xe1   :  { %v727_v61 = vpack.c.bf16 %v720_v45, %v719_v44  ;;  %v703_v62 = vmul.f32 %v695_v46, %v3831_v48  ;;  %v704_v63 = vmul.f32 %v696_v47, %v3833_v49  ;;  %v3377_v44 = vld [vmem:[#allocation8 + $0x104] sm:$0xf]  ;;  %v2771_v45 = vld [vmem:[#allocation8 + $0x110] sm:$0xf0]  ;;  %1632 = vmatpush.bf16.msra.mxu2 %v2898_v36 }
  0xe2   :  { %v3437_v46 = vld [vmem:[#allocation8 + $0x2e4] sm:$0xf]  ;;  %v2774_v50 = vor.u32 %v3377_v44, %v2771_v45  ;;  %1646 = vmatpush.bf16.msra.mxu3 %v3026_v42  ;;  %1660 = vmatpush.bf16.msrb.mxu0 %v2646_v43  ;;  %v2963_v36 = vld [vmem:[#allocation8 + $0x290] sm:$0xf0]  ;;  %v648_v43 = vmul.f32 0.5, %v3825_v9 }
  0xe3   :  { %v731_v6 = vunpack.c.l.bf16 %v727_v61  ;;  %v732_v7 = vunpack.c.h.bf16 %v727_v61  ;;  %v709_v10 = vpack.c.bf16 %v704_v63, %v703_v62  ;;  %v3142_v61 = vor.u32 %v3469_v56, %v3139_v57  ;;  %v3457_v37 = vld [vmem:[#allocation8 + $0x384] sm:$0xf]  ;;  %v2947_v9 = vld [vmem:[#allocation8 + $0x270] sm:$0xf0] }
  0xe4   :  { %v616_v2 = vpop.f32.mrf.mxu2  ;;  %v590_v25 = vpop.f32.mrf.mxu0  ;;  %1674 = vmatpush.bf16.msrb.mxu1 %v2774_v50  ;;  %v652_v56 = vmul.f32 0.5, %v3833_v49 }
  0xe5   :  { %v617_v11 = vadd.f32 %v616_v2, %v188_v32  ;;  %v630_v12 = vpop.f32.mrf.mxu3  ;;  %v739_v21 = vmul.f32 0.796875, %v731_v6  ;;  %v740_v55 = vmul.f32 0.796875, %v732_v7  ;;  %v715_v22 = vunpack.c.l.bf16 %v709_v10  ;;  %v2995_v2 = vld [vmem:[#allocation8 + $0x2d0] sm:$0xf0]  ;;  %v604_v5 = vpop.f32.mrf.mxu1  ;;  %v3465_v7 = vld [vmem:[#allocation8 + $0x3c4] sm:$0xf] }
  0xe6   :  { %v716_v23 = vunpack.c.h.bf16 %v709_v10  ;;  %v591_v41 = vadd.f32 %v590_v25, %v187_v31  ;;  %v3014_v31 = vor.u32 %v3437_v46, %v3011_v54  ;;  %v3123_v10 = vld [vmem:[#allocation8 + $0x3d0] sm:$0xf0]  ;;  %1695 = vmatpush.bf16.msrb.mxu3 %v3142_v61  ;;  %v2998_v15 = vor.u32 %v3433_v1, %v2995_v2  ;;  %v3453_v2 = vld [vmem:[#allocation8 + $0x364] sm:$0xf] }
  0xe7   :  { %v631_v26 = vadd.f32 %v630_v12, %v617_v11  ;;  %v747_v33 = vpack.c.bf16 %v740_v55, %v739_v21  ;;  %v723_v34 = vadd.f32 %v715_v22, %v3831_v48  ;;  %v3107_v21 = vld [vmem:[#allocation8 + $0x3b0] sm:$0xf0]  ;;  %v651_v54 = vmul.f32 0.5, %v3831_v48 }
  0xe8   :  { %v724_v35 = vadd.f32 %v716_v23, %v3833_v49  ;;  %1681 = vmatpush.bf16.msrb.mxu2 %v3014_v31  ;;  %v605_v13 = vadd.f32 %v604_v5, %v591_v41  ;;  %v2982_v23 = vor.u32 %v3429_v17, %v2979_v20  ;;  %v3110_v25 = vor.u32 %v3461_v51, %v3107_v21  ;;  %v3091_v41 = vld [vmem:[#allocation8 + $0x390] sm:$0xf0] }
  0xe9   :  { %v636_v40 = vpack.c.bf16 %v631_v26, %v603_v16  ;;  %v751_v52 = vunpack.c.l.bf16 %v747_v33  ;;  %v752_v53 = vunpack.c.h.bf16 %v747_v33  ;;  %v3126_v16 = vor.u32 %v3465_v7, %v3123_v10  ;;  %v3059_v17 = vld [vmem:[#allocation8 + $0x350] sm:$0xf0] }
  0xea   :  { %v729_v47 = vpack.c.bf16 %v724_v35, %v723_v34  ;;  %v3425_v35 = vld [vmem:[#allocation8 + $0x284] sm:$0xf]  ;;  %v3094_v50 = vor.u32 %v3457_v37, %v3091_v41  ;;  %v655_v10 = vpack.c.bf16 %v648_v43, %v3864_v14 }
  0xeb   :  { %v3855_v58 = vunpack.c.l.bf16 %v636_v40  ;;  %v3857_v59 = vunpack.c.h.bf16 %v636_v40  ;;  %3519 = vtanh.f32 %v751_v52  ;;  %1696 = vmatpush.bf16.msrb.mxu3 %v3126_v16  ;;  %v2966_v44 = vor.u32 %v3425_v35, %v2963_v36 }
  0xec   :  { %v618_v60 = vpop.f32.mrf.mxu2  ;;  %v735_v62 = vunpack.c.l.bf16 %v729_v47  ;;  %v736_v63 = vunpack.c.h.bf16 %v729_v47  ;;  %3521 = vtanh.f32 %v752_v53  ;;  %1682 = vmatpush.bf16.msrb.mxu2 %v2998_v15  ;;  %v657_v15 = vpack.c.bf16 %v652_v56, %v651_v54  ;;  %v2761_v54 = vld [vmem:[#allocation8 + $0xe8] sm:$0xf]  ;;  %v3409_v56 = vld [vmem:[#allocation8 + $0x204] sm:$0xf] }
  0xed   :  { %v619_v0 = vadd.f32 %v618_v60, %v188_v32  ;;  %v661_v3 = vmul.f32 0.044677734, %v3855_v58  ;;  %v662_v4 = vmul.f32 0.044677734, %v3857_v59  ;;  %v632_v6 = vpop.f32.mrf.mxu3 }
  0xee   :  { %v743_v11 = vmul.f32 0.796875, %v735_v62  ;;  %v744_v12 = vmul.f32 0.796875, %v736_v63  ;;  %v3421_v62 = vld [vmem:[#allocation8 + $0x264] sm:$0xf] }
  0xef   :  { %v633_v24 = vadd.f32 %v632_v6, %v619_v0  ;;  %v668_v32 = vpack.c.bf16 %v662_v4, %v661_v3  ;;  %1697 = vmatpush.bf16.msrb.mxu3 %v3110_v25  ;;  %v2950_v1 = vor.u32 %v3421_v62, %v2947_v9  ;;  %v3075_v3 = vld [vmem:[#allocation8 + $0x370] sm:$0xf0]  ;;  %v3376_v9 = vld [vmem:[#allocation8 + $0xf4] sm:$0xf0] }
  0xf0   :  { %v749_v18 = vpack.c.bf16 %v744_v12, %v743_v11  ;;  %1683 = vmatpush.bf16.msrb.mxu2 %v2982_v23  ;;  %v3078_v49 = vor.u32 %v3453_v2, %v3075_v3  ;;  %v3417_v12 = vld [vmem:[#allocation8 + $0x244] sm:$0xf] }
  0xf1   :  { %v638_v19 = vpack.c.bf16 %v633_v24, %v605_v13  ;;  %v673_v55 = vunpack.c.l.bf16 %v668_v32  ;;  %v674_v22 = vunpack.c.h.bf16 %v668_v32  ;;  %v3520_v26 = vpop.eup %3519  ;;  %v2931_v13 = vld [vmem:[#allocation8 + $0x250] sm:$0xf0]  ;;  %v3449_v24 = vld [vmem:[#allocation8 + $0x344] sm:$0xf] }
  0xf2   :  { %v755_v8 = vunpack.c.l.bf16 %v749_v18  ;;  %v756_v29 = vunpack.c.h.bf16 %v749_v18  ;;  %v3522_v30 = vpop.eup %3521  ;;  %v2934_v20 = vor.u32 %v3417_v12, %v2931_v13  ;;  %v3062_v51 = vor.u32 %v3449_v24, %v3059_v17  ;;  %v2745_v24 = vld [vmem:[#allocation8 + $0xc8] sm:$0xf]  ;;  %v3372_v17 = vld [vmem:[#allocation8 + $0xd4] sm:$0xf0] }
  0xf3   :  { %v3866_v27 = vunpack.c.l.bf16 %v638_v19  ;;  %v3868_v28 = vunpack.c.h.bf16 %v638_v19  ;;  %v681_v33 = vmul.f32 %v673_v55, %v3855_v58  ;;  %v682_v34 = vmul.f32 %v674_v22, %v3857_v59  ;;  %1698 = vmatpush.bf16.msrb.mxu3 %v3094_v50 }
  0xf4   :  { %3523 = vtanh.f32 %v755_v8  ;;  %v767_v40 = vpack.c.bf16 %v3522_v30, %v3520_v26  ;;  %1684 = vmatpush.bf16.msrb.mxu2 %v2966_v44  ;;  %v791_v26 = vunpack.c.l.bf16 %v655_v10  ;;  %v2915_v30 = vld [vmem:[#allocation8 + $0x230] sm:$0xf0]  ;;  %v2762_v12 = vor.u32 %v3376_v9, %v2761_v54  ;;  %v3392_v54 = vld [vmem:[#allocation8 + $0x174] sm:$0xf0] }
  0xf5   :  { %v665_v38 = vmul.f32 0.044677734, %v3866_v27  ;;  %v666_v39 = vmul.f32 0.044677734, %v3868_v28  ;;  %v688_v42 = vpack.c.bf16 %v682_v34, %v681_v33  ;;  %3525 = vtanh.f32 %v756_v29  ;;  %v3413_v29 = vld [vmem:[#allocation8 + $0x224] sm:$0xf] }
  0xf6   :  { %v771_v46 = vunpack.c.l.bf16 %v767_v40  ;;  %v772_v47 = vunpack.c.h.bf16 %v767_v40  ;;  %v3445_v33 = vld [vmem:[#allocation8 + $0x324] sm:$0xf]  ;;  %v792_v40 = vunpack.c.h.bf16 %v655_v10 }
  0xf7   :  { %v670_v45 = vpack.c.bf16 %v666_v39, %v665_v38  ;;  %v693_v52 = vunpack.c.l.bf16 %v688_v42  ;;  %v694_v53 = vunpack.c.h.bf16 %v688_v42  ;;  %1699 = vmatpush.bf16.msrb.mxu3 %v3078_v49  ;;  %v3043_v38 = vld [vmem:[#allocation8 + $0x330] sm:$0xf0]  ;;  %v2918_v42 = vor.u32 %v3413_v29, %v2915_v30  ;;  %v2857_v30 = vld [vmem:[#allocation8 + $0x1a8] sm:$0xf] }
  0xf8   :  { %v779_v31 = vadd.f32 1.0, %v771_v46  ;;  %v780_v61 = vadd.f32 1.0, %v772_v47  ;;  %1685 = vmatpush.bf16.msrb.mxu2 %v2950_v1  ;;  %v3046_v46 = vor.u32 %v3445_v33, %v3043_v38  ;;  %v3400_v33 = vld [vmem:[#allocation8 + $0x1b4] sm:$0xf0] }
  0xf9   :  { %v677_v57 = vunpack.c.l.bf16 %v670_v45  ;;  %v678_v60 = vunpack.c.h.bf16 %v670_v45  ;;  %v701_v63 = vmul.f32 %v693_v52, %v3855_v58  ;;  %v702_v0 = vmul.f32 %v694_v53, %v3857_v59  ;;  %v3364_v38 = vld [vmem:[#allocation8 + $0x94] sm:$0xf0] }
  0xfa   :  { %v3524_v4 = vpop.eup %3523  ;;  %v787_v11 = vpack.c.bf16 %v780_v61, %v779_v31  ;;  %v795_v45 = vunpack.c.l.bf16 %v657_v15  ;;  %v796_v53 = vunpack.c.h.bf16 %v657_v15 }
  0xfb   :  { %v685_v5 = vmul.f32 %v677_v57, %v3866_v27  ;;  %v686_v48 = vmul.f32 %v678_v60, %v3868_v28  ;;  %v3526_v6 = vpop.eup %3525  ;;  %v708_v7 = vpack.c.bf16 %v702_v0, %v701_v63  ;;  %1700 = vmatpush.bf16.msrb.mxu3 %v3062_v51  ;;  %v2899_v57 = vld [vmem:[#allocation8 + $0x210] sm:$0xf0]  ;;  %v2889_v63 = vld [vmem:[#allocation8 + $0x1e8] sm:$0xf]  ;;  %v3408_v0 = vld [vmem:[#allocation8 + $0x1f4] sm:$0xf0] }
  0xfc   :  { %v769_v16 = vpack.c.bf16 %v3526_v6, %v3524_v4  ;;  %v799_v8 = vunpack.c.l.bf16 %v787_v11  ;;  %v800_v41 = vunpack.c.h.bf16 %v787_v11  ;;  %1686 = vmatpush.bf16.msrb.mxu2 %v2934_v20  ;;  %v2902_v4 = vor.u32 %v3409_v56, %v2899_v57 }
  0xfd   :  { %v690_v32 = vpack.c.bf16 %v686_v48, %v685_v5  ;;  %v713_v18 = vunpack.c.l.bf16 %v708_v7  ;;  %v714_v19 = vunpack.c.h.bf16 %v708_v7  ;;  %v3441_v5 = vld [vmem:[#allocation8 + $0x304] sm:$0xf]  ;;  %v3027_v48 = vld [vmem:[#allocation8 + $0x310] sm:$0xf0]  ;;  %v2890_v13 = vor.u32 %v3408_v0, %v2889_v63  ;;  %v2809_v63 = vld [vmem:[#allocation8 + $0x148] sm:$0xf] }
  0xfe   :  { %v775_v22 = vunpack.c.l.bf16 %v769_v16  ;;  %v776_v23 = vunpack.c.h.bf16 %v769_v16  ;;  %v807_v52 = vmul.f32 %v799_v8, %v791_v26  ;;  %v808_v3 = vmul.f32 %v800_v41, %v792_v40  ;;  %v3368_v26 = vld [vmem:[#allocation8 + $0xb4] sm:$0xf0] }
  0xff   :  { %v697_v21 = vunpack.c.l.bf16 %v690_v32  ;;  %v698_v55 = vunpack.c.h.bf16 %v690_v32  ;;  %v721_v14 = vadd.f32 %v713_v18, %v3855_v58  ;;  %v722_v25 = vadd.f32 %v714_v19, %v3857_v59  ;;  %1701 = vmatpush.bf16.msrb.mxu3 %v3046_v46  ;;  %v2873_v18 = vld [vmem:[#allocation8 + $0x1c8] sm:$0xf]  ;;  %v3404_v19 = vld [vmem:[#allocation8 + $0x1d4] sm:$0xf0] }
 0x100   :  { %v783_v36 = vadd.f32 1.0, %v775_v22  ;;  %v784_v37 = vadd.f32 1.0, %v776_v23  ;;  %1687 = vmatpush.bf16.msrb.mxu2 %v2918_v42  ;;  %v3030_v20 = vor.u32 %v3441_v5, %v3027_v48  ;;  %v2746_v23 = vor.u32 %v3372_v17, %v2745_v24  ;;  %v3396_v40 = vld [vmem:[#allocation8 + $0x194] sm:$0xf0] }
 0x101   :  { %v705_v34 = vmul.f32 %v697_v21, %v3866_v27  ;;  %v706_v35 = vmul.f32 %v698_v55, %v3868_v28  ;;  %v728_v39 = vpack.c.bf16 %v722_v25, %v721_v14  ;;  %v2874_v14 = vor.u32 %v3404_v19, %v2873_v18  ;;  %v2729_v25 = vld [vmem:[#allocation8 + $0xa8] sm:$0xf]  ;;  %v3388_v0 = vld [vmem:[#allocation8 + $0x154] sm:$0xf0] }
 0x102   :  { %v789_v44 = vpack.c.bf16 %v784_v37, %v783_v36  ;;  %v2858_v36 = vor.u32 %v3400_v33, %v2857_v30  ;;  %v2713_v37 = vld [vmem:[#allocation8 + $0x88] sm:$0xf]  ;;  %v650_v5 = vmul.f32 0.5, %v3857_v59  ;;  %v653_v48 = vmul.f32 0.5, %v3866_v27  ;;  %v3384_v24 = vld [vmem:[#allocation8 + $0x134] sm:$0xf0] }
 0x103   :  { %v710_v43 = vpack.c.bf16 %v706_v35, %v705_v34  ;;  %v733_v47 = vunpack.c.l.bf16 %v728_v39  ;;  %v734_v50 = vunpack.c.h.bf16 %v728_v39  ;;  %1702 = vmatpush.bf16.msrb.mxu3 %v3030_v20  ;;  %v2730_v35 = vor.u32 %v3368_v26, %v2729_v25  ;;  %v2841_v39 = vld [vmem:[#allocation8 + $0x188] sm:$0xf]  ;;  %v3440_v30 = vld [vmem:[#allocation8 + $0x2f4] sm:$0xf0] }
 0x104   :  { %v803_v61 = vunpack.c.l.bf16 %v789_v44  ;;  %v804_v62 = vunpack.c.h.bf16 %v789_v44  ;;  %1688 = vmatpush.bf16.msrb.mxu2 %v2902_v4  ;;  %v2842_v46 = vor.u32 %v3396_v40, %v2841_v39  ;;  %v649_v4 = vmul.f32 0.5, %v3855_v58  ;;  %v3374_v39 = vld [vmem:[#allocation8 + $0xec] sm:$0xf] }
 0x105   :  { %v717_v60 = vunpack.c.l.bf16 %v710_v43  ;;  %v718_v31 = vunpack.c.h.bf16 %v710_v43  ;;  %v741_v1 = vmul.f32 0.796875, %v733_v47  ;;  %v742_v2 = vmul.f32 0.796875, %v734_v50  ;;  %v2697_v47 = vld [vmem:[#allocation8 + $0x68] sm:$0xf] }
 0x106   :  { %v811_v7 = vmul.f32 %v803_v61, %v795_v45  ;;  %v812_v10 = vmul.f32 %v804_v62, %v796_v53  ;;  %v2714_v45 = vor.u32 %v3364_v38, %v2713_v37  ;;  %v2825_v53 = vld [vmem:[#allocation8 + $0x168] sm:$0xf]  ;;  %v3356_v62 = vld [vmem:[#allocation8 + $0x54] sm:$0xf0]  ;;  %v656_v17 = vpack.c.bf16 %v650_v5, %v649_v4 }
 0x107   :  { %v725_v49 = vadd.f32 %v717_v60, %v3866_v27  ;;  %v726_v6 = vadd.f32 %v718_v31, %v3868_v28  ;;  %v748_v11 = vpack.c.bf16 %v742_v2, %v741_v1  ;;  %v2826_v31 = vor.u32 %v3392_v54, %v2825_v53  ;;  %v2681_v61 = vld [vmem:[#allocation8 + $0x48] sm:$0xf]  ;;  %v3472_v38 = vld [vmem:[#allocation8 + $0x3f4] sm:$0xf0] }
 0x108   :  { %v3888_v15 = vpack.c.bf16 %v811_v7, %v807_v52  ;;  %v3890_v16 = vpack.c.bf16 %v812_v10, %v808_v3  ;;  %v3360_v52 = vld [vmem:[#allocation8 + $0x74] sm:$0xf0]  ;;  %v2682_v7 = vor.u32 %v3356_v62, %v2681_v61  ;;  %v2810_v10 = vor.u32 %v3388_v0, %v2809_v63  ;;  %v3145_v37 = vld [vmem:[#allocation8 + $0x3e8] sm:$0xf]  ;;  %v3370_v63 = vld [vmem:[#allocation8 + $0xcc] sm:$0xf] }
 0x109   :  { %v730_v32 = vpack.c.bf16 %v726_v6, %v725_v49  ;;  %v753_v51 = vunpack.c.l.bf16 %v748_v11  ;;  %v754_v21 = vunpack.c.h.bf16 %v748_v11  ;;  %v2698_v60 = vor.u32 %v3360_v52, %v2697_v47  ;;  %v2665_v11 = vld [vmem:[#allocation8 + $0x28] sm:$0xf]  ;;  %v2747_v0 = vld [vmem:[#allocation8 + $0xd8] sm:$0xf0] }
 0x10a   :  { %1605 = vmatmul.bf16.vlgmr.msra.gmra.mxu0 %v3888_v15  ;;  %1619 = vmatmul.bf16.vlgmr.msra.gmra.mxu1 %v3890_v16  ;;  %v654_v49 = vmul.f32 0.5, %v3868_v28  ;;  %v793_v26 = vunpack.c.l.bf16 %v656_v17  ;;  %v3146_v53 = vor.u32 %v3472_v38, %v3145_v37  ;;  %v3001_v54 = vld [vmem:[#allocation8 + $0x2c8] sm:$0xf] }
 0x10b   :  { %v737_v55 = vunpack.c.l.bf16 %v730_v32  ;;  %v738_v22 = vunpack.c.h.bf16 %v730_v32  ;;  %1709 = vmatpush.bf16.msra.mxu0 %v2762_v12  ;;  %1723 = vmatpush.bf16.msra.mxu1 %v2890_v13  ;;  %3527 = vtanh.f32 %v753_v51  ;;  %v3352_v12 = vld [vmem:[#allocation8 + $0x34] sm:$0xf0]  ;;  %v2793_v13 = vld [vmem:[#allocation8 + $0x128] sm:$0xf] }
 0x10c   :  { %3529 = vtanh.f32 %v754_v21  ;;  %v658_v18 = vpack.c.bf16 %v654_v49, %v653_v48  ;;  %v2666_v27 = vor.u32 %v3352_v12, %v2665_v11  ;;  %v2794_v28 = vor.u32 %v3384_v24, %v2793_v13  ;;  %v2649_v51 = vld [vmem:[#allocation8 + $0x8] sm:$0xf]  ;;  %v3348_v21 = vld [vmem:[#allocation8 + $0x14] sm:$0xf0]  ;;  %v3366_v11 = vld [vmem:[#allocation8 + $0xac] sm:$0xf] }
 0x10d   :  { %v745_v8 = vmul.f32 0.796875, %v737_v55  ;;  %v746_v29 = vmul.f32 0.796875, %v738_v22  ;;  %v2777_v55 = vld [vmem:[#allocation8 + $0x108] sm:$0xf]  ;;  %v3380_v22 = vld [vmem:[#allocation8 + $0x114] sm:$0xf0]  ;;  %v2650_v40 = vor.u32 %v3348_v21, %v2649_v51  ;;  %v2750_v49 = vor.u32 %v3370_v63, %v2747_v0 }
 0x10e   :  { %v797_v33 = vunpack.c.l.bf16 %v658_v18  ;;  %v3129_v62 = vld [vmem:[#allocation8 + $0x3c8] sm:$0xf]  ;;  %v3432_v48 = vld [vmem:[#allocation8 + $0x2b4] sm:$0xf0]  ;;  %v2731_v12 = vld [vmem:[#allocation8 + $0xb8] sm:$0xf0] }
 0x10f   :  { %v750_v34 = vpack.c.bf16 %v746_v29, %v745_v8  ;;  %1710 = vmatpush.bf16.msra.mxu0 %v2746_v23  ;;  %1724 = vmatpush.bf16.msra.mxu1 %v2874_v14  ;;  %v794_v8 = vunpack.c.h.bf16 %v656_v17  ;;  %v3017_v29 = vld [vmem:[#allocation8 + $0x2e8] sm:$0xf]  ;;  %v3398_v13 = vld [vmem:[#allocation8 + $0x1ac] sm:$0xf]  ;;  %v2859_v24 = vld [vmem:[#allocation8 + $0x1b8] sm:$0xf0] }
 0x110   :  { %v3018_v52 = vor.u32 %v3440_v30, %v3017_v29  ;;  %v2985_v5 = vld [vmem:[#allocation8 + $0x2a8] sm:$0xf]  ;;  %v3428_v17 = vld [vmem:[#allocation8 + $0x294] sm:$0xf0]  ;;  %v2715_v51 = vld [vmem:[#allocation8 + $0x98] sm:$0xf0] }
 0x111   :  { %v757_v41 = vunpack.c.l.bf16 %v750_v34  ;;  %v758_v42 = vunpack.c.h.bf16 %v750_v34  ;;  %v3528_v43 = vpop.eup %3527  ;;  %v3394_v21 = vld [vmem:[#allocation8 + $0x18c] sm:$0xf]  ;;  %v3081_v29 = vld [vmem:[#allocation8 + $0x368] sm:$0xf]  ;;  %v3456_v30 = vld [vmem:[#allocation8 + $0x374] sm:$0xf0] }
 0x112   :  { %v3530_v44 = vpop.eup %3529  ;;  %v3082_v38 = vor.u32 %v3456_v30, %v3081_v29  ;;  %v3350_v63 = vld [vmem:[#allocation8 + $0x2c] sm:$0xf]  ;;  %v2667_v0 = vld [vmem:[#allocation8 + $0x38] sm:$0xf0] }
 0x113   :  { %3531 = vtanh.f32 %v757_v41  ;;  %1711 = vmatpush.bf16.msra.mxu0 %v2730_v35  ;;  %1725 = vmatpush.bf16.msra.mxu1 %v2858_v36  ;;  %v768_v50 = vpack.c.bf16 %v3530_v44, %v3528_v43  ;;  %v798_v35 = vunpack.c.h.bf16 %v658_v18  ;;  %v2778_v41 = vor.u32 %v3380_v22, %v2777_v55  ;;  %v3406_v43 = vld [vmem:[#allocation8 + $0x1ec] sm:$0xf]  ;;  %v2891_v44 = vld [vmem:[#allocation8 + $0x1f8] sm:$0xf0] }
 0x114   :  { %3533 = vtanh.f32 %v758_v42  ;;  %v2763_v42 = vld [vmem:[#allocation8 + $0xf8] sm:$0xf0]  ;;  %v2894_v61 = vor.u32 %v3406_v43, %v2891_v44  ;;  %v2734_v18 = vor.u32 %v3366_v11, %v2731_v12  ;;  %v3065_v43 = vld [vmem:[#allocation8 + $0x348] sm:$0xf]  ;;  %v3452_v44 = vld [vmem:[#allocation8 + $0x354] sm:$0xf0] }
 0x115   :  { %v773_v56 = vunpack.c.l.bf16 %v768_v50  ;;  %v774_v57 = vunpack.c.h.bf16 %v768_v50  ;;  %v2843_v55 = vld [vmem:[#allocation8 + $0x198] sm:$0xf0]  ;;  %v3346_v11 = vld [vmem:[#allocation8 + $0xc] sm:$0xf] }
 0x116   :  { %v2651_v12 = vld [vmem:[#allocation8 + $0x18] sm:$0xf0]  ;;  %v3462_v29 = vld [vmem:[#allocation8 + $0x3ac] sm:$0xf] }
 0x117   :  { %1712 = vmatpush.bf16.msra.mxu0 %v2714_v45  ;;  %1726 = vmatpush.bf16.msra.mxu1 %v2842_v46  ;;  %v781_v1 = vadd.f32 1.0, %v773_v56  ;;  %v782_v2 = vadd.f32 1.0, %v774_v57  ;;  %v3436_v56 = vld [vmem:[#allocation8 + $0x2d4] sm:$0xf0]  ;;  %v3115_v30 = vld [vmem:[#allocation8 + $0x3b8] sm:$0xf0] }
 0x119   :  { %v3532_v9 = vpop.eup %3531  ;;  %v788_v59 = vpack.c.bf16 %v782_v2, %v781_v1  ;;  %v3402_v1 = vld [vmem:[#allocation8 + $0x1cc] sm:$0xf]  ;;  %v2875_v2 = vld [vmem:[#allocation8 + $0x1d8] sm:$0xf0] }
 0x11a   :  { %v3534_v3 = vpop.eup %3533  ;;  %1661 = vmatmul.bf16.vlgmr.msrb.gmra.mxu0 %v3888_v15  ;;  %1675 = vmatmul.bf16.vlgmr.msrb.gmra.mxu1 %v3890_v16 }
 0x11b   :  { %v770_v6 = vpack.c.bf16 %v3534_v3, %v3532_v9  ;;  %1713 = vmatpush.bf16.msra.mxu0 %v2698_v60  ;;  %1727 = vmatpush.bf16.msra.mxu1 %v2826_v31  ;;  %v801_v14 = vunpack.c.l.bf16 %v788_v59  ;;  %v802_v25 = vunpack.c.h.bf16 %v788_v59  ;;  %v2766_v31 = vor.u32 %v3374_v39, %v2763_v42  ;;  %v3468_v9 = vld [vmem:[#allocation8 + $0x3d4] sm:$0xf0]  ;;  %v2969_v59 = vld [vmem:[#allocation8 + $0x288] sm:$0xf] }
 0x11c   :  { %v3002_v3 = vor.u32 %v3436_v56, %v3001_v54  ;;  %v3130_v4 = vor.u32 %v3468_v9, %v3129_v62  ;;  %v2970_v22 = vor.u32 %v3428_v17, %v2969_v59  ;;  %v2937_v39 = vld [vmem:[#allocation8 + $0x248] sm:$0xf]  ;;  %v3416_v56 = vld [vmem:[#allocation8 + $0x234] sm:$0xf0]  ;;  %v3470_v59 = vld [vmem:[#allocation8 + $0x3ec] sm:$0xf] }
 0x11d   :  { %v777_v58 = vunpack.c.l.bf16 %v770_v6  ;;  %v778_v32 = vunpack.c.h.bf16 %v770_v6  ;;  %v809_v45 = vmul.f32 %v801_v14, %v793_v26  ;;  %v810_v47 = vmul.f32 %v802_v25, %v794_v8  ;;  %v2953_v14 = vld [vmem:[#allocation8 + $0x268] sm:$0xf]  ;;  %v3424_v25 = vld [vmem:[#allocation8 + $0x274] sm:$0xf0]  ;;  %v3147_v17 = vld [vmem:[#allocation8 + $0x3f8] sm:$0xf0] }
 0x11e   :  { %v2878_v6 = vor.u32 %v3402_v1, %v2875_v2  ;;  %v2846_v8 = vor.u32 %v3394_v21, %v2843_v55  ;;  %v2954_v37 = vor.u32 %v3424_v25, %v2953_v14  ;;  %v2921_v54 = vld [vmem:[#allocation8 + $0x228] sm:$0xf]  ;;  %v3448_v9 = vld [vmem:[#allocation8 + $0x334] sm:$0xf0]  ;;  %v3382_v1 = vld [vmem:[#allocation8 + $0x12c] sm:$0xf] }
 0x11f   :  { %v785_v19 = vadd.f32 1.0, %v777_v58  ;;  %v786_v20 = vadd.f32 1.0, %v778_v32  ;;  %1714 = vmatpush.bf16.msra.mxu0 %v2682_v7  ;;  %1728 = vmatpush.bf16.msra.mxu1 %v2810_v10  ;;  %v3113_v7 = vld [vmem:[#allocation8 + $0x3a8] sm:$0xf]  ;;  %v3464_v10 = vld [vmem:[#allocation8 + $0x3b4] sm:$0xf0]  ;;  %v2986_v58 = vor.u32 %v3432_v48, %v2985_v5 }
 0x120   :  { %v3114_v32 = vor.u32 %v3464_v10, %v3113_v7  ;;  %v3049_v62 = vld [vmem:[#allocation8 + $0x328] sm:$0xf]  ;;  %v2795_v2 = vld [vmem:[#allocation8 + $0x138] sm:$0xf0]  ;;  %v3412_v48 = vld [vmem:[#allocation8 + $0x214] sm:$0xf0] }
 0x121   :  { %v790_v23 = vpack.c.bf16 %v786_v20, %v785_v19  ;;  %v2862_v19 = vor.u32 %v3398_v13, %v2859_v24  ;;  %v3097_v20 = vld [vmem:[#allocation8 + $0x388] sm:$0xf]  ;;  %v2798_v7 = vor.u32 %v3382_v1, %v2795_v2  ;;  %v3444_v10 = vld [vmem:[#allocation8 + $0x314] sm:$0xf0]  ;;  %v3378_v13 = vld [vmem:[#allocation8 + $0x10c] sm:$0xf] }
 0x122   :  { %v2905_v5 = vld [vmem:[#allocation8 + $0x208] sm:$0xf]  ;;  %v2779_v24 = vld [vmem:[#allocation8 + $0x118] sm:$0xf0]  ;;  %v3434_v21 = vld [vmem:[#allocation8 + $0x2cc] sm:$0xf] }
 0x123   :  { %v805_v34 = vunpack.c.l.bf16 %v790_v23  ;;  %v806_v36 = vunpack.c.h.bf16 %v790_v23  ;;  %1715 = vmatpush.bf16.msra.mxu0 %v2666_v27  ;;  %1729 = vmatpush.bf16.msra.mxu1 %v2794_v28  ;;  %v3460_v27 = vld [vmem:[#allocation8 + $0x394] sm:$0xf0]  ;;  %v3362_v28 = vld [vmem:[#allocation8 + $0x8c] sm:$0xf]  ;;  %v3003_v55 = vld [vmem:[#allocation8 + $0x2d8] sm:$0xf0] }
 0x124   :  { %v3098_v23 = vor.u32 %v3460_v27, %v3097_v20  ;;  %v2718_v26 = vor.u32 %v3362_v28, %v2715_v51  ;;  %v2654_v20 = vor.u32 %v3346_v11, %v2651_v12  ;;  %v2782_v27 = vor.u32 %v3378_v13, %v2779_v24  ;;  %v3442_v1 = vld [vmem:[#allocation8 + $0x30c] sm:$0xf]  ;;  %v3035_v2 = vld [vmem:[#allocation8 + $0x318] sm:$0xf0] }
 0x125   :  { %v813_v46 = vmul.f32 %v805_v34, %v797_v33  ;;  %v814_v50 = vmul.f32 %v806_v36, %v798_v35  ;;  %v3358_v33 = vld [vmem:[#allocation8 + $0x6c] sm:$0xf]  ;;  %v2699_v34 = vld [vmem:[#allocation8 + $0x78] sm:$0xf0]  ;;  %v3150_v51 = vor.u32 %v3470_v59, %v3147_v17  ;;  %v3006_v14 = vor.u32 %v3434_v21, %v3003_v55 }
 0x126   :  { %v3390_v35 = vld [vmem:[#allocation8 + $0x16c] sm:$0xf]  ;;  %v2827_v36 = vld [vmem:[#allocation8 + $0x178] sm:$0xf0] }
 0x127   :  { %v3900_v57 = vpack.c.bf16 %v813_v46, %v809_v45  ;;  %v3902_v60 = vpack.c.bf16 %v814_v50, %v810_v47  ;;  %1716 = vmatpush.bf16.msra.mxu0 %v2650_v40  ;;  %1730 = vmatpush.bf16.msra.mxu1 %v2778_v41  ;;  %v3420_v40 = vld [vmem:[#allocation8 + $0x254] sm:$0xf0]  ;;  %v2702_v41 = vor.u32 %v3358_v33, %v2699_v34  ;;  %v3354_v45 = vld [vmem:[#allocation8 + $0x4c] sm:$0xf]  ;;  %v2683_v46 = vld [vmem:[#allocation8 + $0x58] sm:$0xf0] }
 0x128   :  { %v2830_v42 = vor.u32 %v3390_v35, %v2827_v36  ;;  %v3386_v47 = vld [vmem:[#allocation8 + $0x14c] sm:$0xf]  ;;  %v2811_v50 = vld [vmem:[#allocation8 + $0x158] sm:$0xf0]  ;;  %v3118_v34 = vor.u32 %v3462_v29, %v3115_v30 }
 0x129   :  { %1633 = vmatmul.bf16.vlgmr.msra.gmra.mxu2 %v3900_v57  ;;  %1647 = vmatmul.bf16.vlgmr.msra.gmra.mxu3 %v3902_v60  ;;  %v3426_v35 = vld [vmem:[#allocation8 + $0x28c] sm:$0xf]  ;;  %v2971_v36 = vld [vmem:[#allocation8 + $0x298] sm:$0xf0] }
 0x12a   :  { %1737 = vmatpush.bf16.msra.mxu2 %v3018_v52  ;;  %1751 = vmatpush.bf16.msra.mxu3 %v3146_v53  ;;  %v2938_v52 = vor.u32 %v3420_v40, %v2937_v39  ;;  %v3066_v53 = vor.u32 %v3452_v44, %v3065_v43  ;;  %v2974_v39 = vor.u32 %v3426_v35, %v2971_v36  ;;  %v3454_v43 = vld [vmem:[#allocation8 + $0x36c] sm:$0xf]  ;;  %v3083_v44 = vld [vmem:[#allocation8 + $0x378] sm:$0xf0] }
 0x12b   :  { %1765 = vmatpush.bf16.msrb.mxu0 %v2766_v31  ;;  %1779 = vmatpush.bf16.msrb.mxu1 %v2894_v61  ;;  %v2686_v31 = vor.u32 %v3354_v45, %v2683_v46  ;;  %v2814_v61 = vor.u32 %v3386_v47, %v2811_v50  ;;  %v3418_v45 = vld [vmem:[#allocation8 + $0x24c] sm:$0xf]  ;;  %v2939_v46 = vld [vmem:[#allocation8 + $0x258] sm:$0xf0] }
 0x12c   :  { %1717 = vmatmul.bf16.vlgmr.msra.gmra.mxu0 %v3888_v15  ;;  %1731 = vmatmul.bf16.vlgmr.msra.gmra.mxu1 %v3890_v16  ;;  %v3450_v47 = vld [vmem:[#allocation8 + $0x34c] sm:$0xf]  ;;  %v3067_v50 = vld [vmem:[#allocation8 + $0x358] sm:$0xf0] }
 0x12e   :  { %1738 = vmatpush.bf16.msra.mxu2 %v3002_v3  ;;  %1752 = vmatpush.bf16.msra.mxu3 %v3130_v4  ;;  %v2922_v3 = vor.u32 %v3416_v56, %v2921_v54  ;;  %v3050_v4 = vor.u32 %v3448_v9, %v3049_v62  ;;  %v3414_v54 = vld [vmem:[#allocation8 + $0x22c] sm:$0xf]  ;;  %v2923_v56 = vld [vmem:[#allocation8 + $0x238] sm:$0xf0] }
 0x12f   :  { %1766 = vmatpush.bf16.msrb.mxu0 %v2750_v49  ;;  %1780 = vmatpush.bf16.msrb.mxu1 %v2878_v6  ;;  %v3033_v49 = vld [vmem:[#allocation8 + $0x308] sm:$0xf]  ;;  %v2670_v6 = vor.u32 %v3350_v63, %v2667_v0  ;;  %v2926_v62 = vor.u32 %v3414_v54, %v2923_v56  ;;  %v3410_v63 = vld [vmem:[#allocation8 + $0x20c] sm:$0xf]  ;;  %v2907_v0 = vld [vmem:[#allocation8 + $0x218] sm:$0xf0] }
 0x132   :  { %1739 = vmatpush.bf16.msra.mxu2 %v2986_v58  ;;  %1753 = vmatpush.bf16.msra.mxu3 %v3114_v32  ;;  %v3438_v58 = vld [vmem:[#allocation8 + $0x2ec] sm:$0xf]  ;;  %v3019_v32 = vld [vmem:[#allocation8 + $0x2f8] sm:$0xf0] }
 0x133   :  { %1767 = vmatpush.bf16.msrb.mxu0 %v2734_v18  ;;  %1781 = vmatpush.bf16.msrb.mxu1 %v2862_v19  ;;  %v2906_v18 = vor.u32 %v3412_v48, %v2905_v5  ;;  %v3034_v19 = vor.u32 %v3444_v10, %v3033_v49  ;;  %v3022_v28 = vor.u32 %v3438_v58, %v3019_v32  ;;  %v3916_v10 = vld [vmem:[#allocation10] sm:$0xf] }
 0x134   :  { %v949_v12 = vperm.slane %v3916_v10, 0  ;;  %v950_v24 = vperm.slane %v3916_v10, 1 }
 0x136   :  { %1740 = vmatpush.bf16.msra.mxu2 %v2970_v22  ;;  %1754 = vmatpush.bf16.msra.mxu3 %v3098_v23  ;;  %v3466_v22 = vld [vmem:[#allocation8 + $0x3cc] sm:$0xf]  ;;  %v3131_v23 = vld [vmem:[#allocation8 + $0x3d8] sm:$0xf0] }
 0x137   :  { %1768 = vmatpush.bf16.msrb.mxu0 %v2718_v26  ;;  %1782 = vmatpush.bf16.msrb.mxu1 %v2846_v8  ;;  %v3134_v25 = vor.u32 %v3466_v22, %v3131_v23  ;;  %v3430_v26 = vld [vmem:[#allocation8 + $0x2ac] sm:$0xf]  ;;  %v2987_v8 = vld [vmem:[#allocation8 + $0x2b8] sm:$0xf0] }
 0x138   :  { %v2990_v33 = vor.u32 %v3430_v26, %v2987_v8 }
 0x139   :  { %1689 = vmatmul.bf16.vlgmr.msrb.gmra.mxu2 %v3900_v57  ;;  %1703 = vmatmul.bf16.vlgmr.msrb.gmra.mxu3 %v3902_v60 }
 0x13a   :  { %1741 = vmatpush.bf16.msra.mxu2 %v2954_v37  ;;  %1755 = vmatpush.bf16.msra.mxu3 %v3082_v38  ;;  %v3458_v37 = vld [vmem:[#allocation8 + $0x38c] sm:$0xf]  ;;  %v3099_v38 = vld [vmem:[#allocation8 + $0x398] sm:$0xf0] }
 0x13b   :  { %1769 = vmatpush.bf16.msrb.mxu0 %v2702_v41  ;;  %1783 = vmatpush.bf16.msrb.mxu1 %v2830_v42  ;;  %v3102_v40 = vor.u32 %v3458_v37, %v3099_v38  ;;  %v3422_v41 = vld [vmem:[#allocation8 + $0x26c] sm:$0xf]  ;;  %v2955_v42 = vld [vmem:[#allocation8 + $0x278] sm:$0xf0] }
 0x13e   :  { %1742 = vmatpush.bf16.msra.mxu2 %v2938_v52  ;;  %1756 = vmatpush.bf16.msra.mxu3 %v3066_v53  ;;  %v2942_v52 = vor.u32 %v3418_v45, %v2939_v46  ;;  %v3070_v53 = vor.u32 %v3450_v47, %v3067_v50  ;;  %v3479_v45 = vld [vmem:[#allocation11 + $0x30] sm:$0xff] }
 0x13f   :  { %1770 = vmatpush.bf16.msrb.mxu0 %v2686_v31  ;;  %1784 = vmatpush.bf16.msrb.mxu1 %v2814_v61  ;;  %v3446_v31 = vld [vmem:[#allocation8 + $0x32c] sm:$0xf]  ;;  %v3051_v61 = vld [vmem:[#allocation8 + $0x338] sm:$0xf0]  ;;  %v3487_v46 = vld [vmem:[#allocation11 + $0x70] sm:$0xff] }
 0x140   :  { %v3054_v9 = vor.u32 %v3446_v31, %v3051_v61 }
 0x142   :  { %1743 = vmatpush.bf16.msra.mxu2 %v2922_v3  ;;  %1757 = vmatpush.bf16.msra.mxu3 %v3050_v4  ;;  %v2910_v3 = vor.u32 %v3410_v63, %v2907_v0  ;;  %v3038_v4 = vor.u32 %v3442_v1, %v3035_v2 }
 0x143   :  { %1771 = vmatpush.bf16.msrb.mxu0 %v2670_v6  ;;  %1785 = vmatpush.bf16.msrb.mxu1 %v2798_v7 }
 0x146   :  { %1744 = vmatpush.bf16.msra.mxu2 %v2906_v18  ;;  %1758 = vmatpush.bf16.msra.mxu3 %v3034_v19 }
 0x147   :  { %1772 = vmatpush.bf16.msrb.mxu0 %v2654_v20  ;;  %1786 = vmatpush.bf16.msrb.mxu1 %v2782_v27 }
 0x149   :  { %1745 = vmatmul.bf16.vlgmr.msra.gmra.mxu2 %v3900_v57  ;;  %1759 = vmatmul.bf16.vlgmr.msra.gmra.mxu3 %v3902_v60 }
 0x14a   :  { %1793 = vmatpush.bf16.msrb.mxu2 %v3022_v28  ;;  %1807 = vmatpush.bf16.msrb.mxu3 %v3150_v51 }
 0x14b   :  { %1773 = vmatmul.bf16.vlgmr.msrb.gmra.mxu0 %v3888_v15  ;;  %1787 = vmatmul.bf16.vlgmr.msrb.gmra.mxu1 %v3890_v16  ;;  %v2958_v15 = vor.u32 %v3422_v41, %v2955_v42  ;;  %v3086_v16 = vor.u32 %v3454_v43, %v3083_v44  ;;  %v3480_v42 = vld [vmem:[#allocation11 + $0x38] sm:$0xff] }
 0x14c   :  { %v3488_v43 = vld [vmem:[#allocation11 + $0x78] sm:$0xff]  ;;  %2265 = vmatpush.bf16.msra.mxu0 %v3480_v42 }
 0x14d   :  { %2279 = vmatpush.bf16.msra.mxu1 %v3488_v43 }
 0x14e   :  { %1794 = vmatpush.bf16.msrb.mxu2 %v3006_v14  ;;  %1808 = vmatpush.bf16.msrb.mxu3 %v3134_v25 }
 0x150   :  { %2266 = vmatpush.bf16.msra.mxu0 %v3479_v45  ;;  %v3477_v45 = vld [vmem:[#allocation11 + $0x20] sm:$0xff] }
 0x151   :  { %2280 = vmatpush.bf16.msra.mxu1 %v3487_v46  ;;  %v3485_v46 = vld [vmem:[#allocation11 + $0x60] sm:$0xff] }
 0x152   :  { %1795 = vmatpush.bf16.msrb.mxu2 %v2990_v33  ;;  %1809 = vmatpush.bf16.msrb.mxu3 %v3118_v34 }
 0x156   :  { %1796 = vmatpush.bf16.msrb.mxu2 %v2974_v39  ;;  %1810 = vmatpush.bf16.msrb.mxu3 %v3102_v40 }
 0x15a   :  { %1797 = vmatpush.bf16.msrb.mxu2 %v2958_v15  ;;  %1811 = vmatpush.bf16.msrb.mxu3 %v3086_v16 }
 0x15e   :  { %1798 = vmatpush.bf16.msrb.mxu2 %v2942_v52  ;;  %1812 = vmatpush.bf16.msrb.mxu3 %v3070_v53 }
 0x162   :  { %1799 = vmatpush.bf16.msrb.mxu2 %v2926_v62  ;;  %1813 = vmatpush.bf16.msrb.mxu3 %v3054_v9 }
 0x166   :  { %1800 = vmatpush.bf16.msrb.mxu2 %v2910_v3  ;;  %1814 = vmatpush.bf16.msrb.mxu3 %v3038_v4 }
 0x169   :  { %1801 = vmatmul.bf16.vlgmr.msrb.gmra.mxu2 %v3900_v57  ;;  %1815 = vmatmul.bf16.vlgmr.msrb.gmra.mxu3 %v3902_v60 }
 0x187   :  { %v1606_v5 = vpop.f32.mrf.mxu0  ;;  %v1620_v48 = vpop.f32.mrf.mxu1 }
 0x188   :  { %v1607_v59 = vadd.f32 %v1606_v5, %v949_v12 }
 0x18a   :  { %v1621_v18 = vadd.f32 %v1620_v48, %v1607_v59 }
 0x18f   :  { %v1608_v49 = vpop.f32.mrf.mxu0  ;;  %v1622_v11 = vpop.f32.mrf.mxu1 }
 0x190   :  { %v1609_v51 = vadd.f32 %v1608_v49, %v949_v12 }
 0x192   :  { %v1623_v14 = vadd.f32 %v1622_v11, %v1609_v51 }
 0x197   :  { %v1662_v13 = vpop.f32.mrf.mxu0  ;;  %v1676_v57 = vpop.f32.mrf.mxu1 }
 0x198   :  { %v1663_v17 = vadd.f32 %v1662_v13, %v950_v24 }
 0x19a   :  { %v1677_v60 = vadd.f32 %v1676_v57, %v1663_v17 }
 0x19f   :  { %v1664_v19 = vpop.f32.mrf.mxu0  ;;  %v1678_v26 = vpop.f32.mrf.mxu1 }
 0x1a0   :  { %v1665_v55 = vadd.f32 %v1664_v19, %v950_v24 }
 0x1a2   :  { %v1679_v8 = vadd.f32 %v1678_v26, %v1665_v55 }
 0x1a9   :  { %v1718_v54 = vpop.f32.mrf.mxu0  ;;  %v1732_v49 = vpop.f32.mrf.mxu1 }
 0x1ac   :  { %v1634_v6 = vpop.f32.mrf.mxu2  ;;  %v1648_v7 = vpop.f32.mrf.mxu3 }
 0x1ad   :  { %v1635_v20 = vadd.f32 %v1634_v6, %v1621_v18 }
 0x1af   :  { %v1649_v22 = vadd.f32 %v1648_v7, %v1635_v20 }
 0x1b1   :  { %v1720_v12 = vpop.f32.mrf.mxu0 }
 0x1b4   :  { %v1636_v58 = vpop.f32.mrf.mxu2  ;;  %v1650_v32 = vpop.f32.mrf.mxu3 }
 0x1b5   :  { %v1637_v29 = vadd.f32 %v1636_v58, %v1623_v14 }
 0x1b7   :  { %v1651_v39 = vadd.f32 %v1650_v32, %v1637_v29 }
 0x1bc   :  { %v1690_v27 = vpop.f32.mrf.mxu2  ;;  %v1704_v28 = vpop.f32.mrf.mxu3 }
 0x1bd   :  { %v1691_v21 = vadd.f32 %v1690_v27, %v1677_v60 }
 0x1bf   :  { %v1705_v23 = vadd.f32 %v1704_v28, %v1691_v21 }
 0x1c1   :  { %v1821_v25 = vpack.c.bf16 %v1705_v23, %v1649_v22  ;;  %v1734_v22 = vpop.f32.mrf.mxu1  ;;  %v951_v23 = vperm.slane %v3916_v10, 2 }
 0x1c3   :  { %v3920_v30 = vunpack.c.l.bf16 %v1821_v25  ;;  %v3922_v33 = vunpack.c.h.bf16 %v1821_v25 }
 0x1c4   :  { %v1692_v34 = vpop.f32.mrf.mxu2  ;;  %v1706_v38 = vpop.f32.mrf.mxu3 }
 0x1c5   :  { %v1845_v35 = vmul.f32 0.044677734, %v3920_v30  ;;  %v1846_v36 = vmul.f32 0.044677734, %v3922_v33  ;;  %v1693_v37 = vadd.f32 %v1692_v34, %v1679_v8  ;;  %v952_v34 = vperm.slane %v3916_v10, 3 }
 0x1c7   :  { %v1853_v40 = vpack.c.bf16 %v1846_v36, %v1845_v35  ;;  %v1707_v41 = vadd.f32 %v1706_v38, %v1693_v37  ;;  %v3478_v35 = vld [vmem:[#allocation11 + $0x28] sm:$0xff] }
 0x1c8   :  { %v1774_v8 = vpop.f32.mrf.mxu0  ;;  %v3486_v36 = vld [vmem:[#allocation11 + $0x68] sm:$0xff]  ;;  %2267 = vmatpush.bf16.msra.mxu0 %v3478_v35 }
 0x1c9   :  { %v1857_v44 = vunpack.c.l.bf16 %v1853_v40  ;;  %v1858_v15 = vunpack.c.h.bf16 %v1853_v40  ;;  %v1823_v16 = vpack.c.bf16 %v1707_v41, %v1651_v39  ;;  %v1719_v41 = vadd.f32 %v1718_v54, %v951_v23  ;;  %2281 = vmatpush.bf16.msra.mxu1 %v3486_v36  ;;  %v1788_v10 = vpop.f32.mrf.mxu1 }
 0x1cb   :  { %v1865_v47 = vmul.f32 %v1857_v44, %v3920_v30  ;;  %v1866_v50 = vmul.f32 %v1858_v15, %v3922_v33  ;;  %v3928_v52 = vunpack.c.l.bf16 %v1823_v16  ;;  %v3930_v53 = vunpack.c.h.bf16 %v1823_v16 }
 0x1cc   :  { %v1746_v59 = vpop.f32.mrf.mxu2  ;;  %v1760_v17 = vpop.f32.mrf.mxu3  ;;  %v1775_v16 = vadd.f32 %v1774_v8, %v952_v34  ;;  %2268 = vmatpush.bf16.msra.mxu0 %v3477_v45 }
 0x1cd   :  { %v1873_v56 = vpack.c.bf16 %v1866_v50, %v1865_v47  ;;  %v1849_v31 = vmul.f32 0.044677734, %v3928_v52  ;;  %v1850_v61 = vmul.f32 0.044677734, %v3930_v53  ;;  %v1733_v47 = vadd.f32 %v1732_v49, %v1719_v41  ;;  %2282 = vmatpush.bf16.msra.mxu1 %v3485_v46 }
 0x1ce   :  { %v1837_v35 = vmul.f32 0.5, %v3928_v52  ;;  %v1838_v36 = vmul.f32 0.5, %v3930_v53 }
 0x1cf   :  { %v1877_v62 = vunpack.c.l.bf16 %v1873_v56  ;;  %v1878_v9 = vunpack.c.h.bf16 %v1873_v56  ;;  %v1855_v63 = vpack.c.bf16 %v1850_v61, %v1849_v31  ;;  %v1789_v31 = vadd.f32 %v1788_v10, %v1775_v16 }
 0x1d0   :  { %v1747_v61 = vadd.f32 %v1746_v59, %v1733_v47  ;;  %v1776_v54 = vpop.f32.mrf.mxu0  ;;  %v1843_v10 = vpack.c.bf16 %v1838_v36, %v1837_v35  ;;  %v3503_v47 = vld [vmem:[#allocation11 + $0xf0] sm:$0xff] }
 0x1d1   :  { %v1885_v0 = vmul.f32 %v1877_v62, %v3920_v30  ;;  %v1886_v1 = vmul.f32 %v1878_v9, %v3922_v33  ;;  %v1861_v2 = vunpack.c.l.bf16 %v1855_v63  ;;  %v1862_v3 = vunpack.c.h.bf16 %v1855_v63  ;;  %v3476_v62 = vld [vmem:[#allocation11 + $0x18] sm:$0xff] }
 0x1d2   :  { %v3484_v9 = vld [vmem:[#allocation11 + $0x58] sm:$0xff]  ;;  %2269 = vmatpush.bf16.msra.mxu0 %v3476_v62  ;;  %v1761_v49 = vadd.f32 %v1760_v17, %v1747_v61  ;;  %v3482_v17 = vld [vmem:[#allocation11 + $0x48] sm:$0xff] }
 0x1d3   :  { %v1893_v4 = vpack.c.bf16 %v1886_v1, %v1885_v0  ;;  %v1869_v5 = vmul.f32 %v1861_v2, %v3928_v52  ;;  %v1870_v48 = vmul.f32 %v1862_v3, %v3930_v53  ;;  %v1721_v2 = vadd.f32 %v1720_v12, %v951_v23  ;;  %2283 = vmatpush.bf16.msra.mxu1 %v3484_v9  ;;  %v1790_v12 = vpop.f32.mrf.mxu1 }
 0x1d4   :  { %v1748_v39 = vpop.f32.mrf.mxu2  ;;  %v3946_v40 = vpop.f32.mrf.mxu3 }
 0x1d5   :  { %v1897_v6 = vunpack.c.l.bf16 %v1893_v4  ;;  %v1898_v7 = vunpack.c.h.bf16 %v1893_v4  ;;  %v1875_v11 = vpack.c.bf16 %v1870_v48, %v1869_v5 }
 0x1d7   :  { %v1905_v13 = vadd.f32 %v1897_v6, %v3920_v30  ;;  %v1906_v24 = vadd.f32 %v1898_v7, %v3922_v33  ;;  %v1881_v58 = vunpack.c.l.bf16 %v1875_v11  ;;  %v1882_v32 = vunpack.c.h.bf16 %v1875_v11  ;;  %v3475_v11 = vld [vmem:[#allocation11 + $0x10] sm:$0xff] }
 0x1d8   :  { %v1777_v6 = vadd.f32 %v1776_v54, %v952_v34  ;;  %2270 = vmatpush.bf16.msra.mxu0 %v3475_v11 }
 0x1d9   :  { %v1913_v57 = vpack.c.bf16 %v1906_v24, %v1905_v13  ;;  %v1889_v18 = vmul.f32 %v1881_v58, %v3928_v52  ;;  %v1890_v60 = vmul.f32 %v1882_v32, %v3930_v53  ;;  %v3483_v13 = vld [vmem:[#allocation11 + $0x50] sm:$0xff]  ;;  %v1735_v24 = vadd.f32 %v1734_v22, %v1721_v2 }
 0x1da   :  { %2284 = vmatpush.bf16.msra.mxu1 %v3483_v13 }
 0x1db   :  { %v1917_v19 = vunpack.c.l.bf16 %v1913_v57  ;;  %v1918_v20 = vunpack.c.h.bf16 %v1913_v57  ;;  %v1895_v27 = vpack.c.bf16 %v1890_v60, %v1889_v18  ;;  %v1749_v57 = vadd.f32 %v1748_v39, %v1735_v24 }
 0x1dc   :  { %v1791_v60 = vadd.f32 %v1790_v12, %v1777_v6  ;;  %v3494_v6 = vld [vmem:[#allocation11 + $0xa8] sm:$0xff] }
 0x1dd   :  { %v1925_v28 = vmul.f32 0.796875, %v1917_v19  ;;  %v1926_v51 = vmul.f32 0.796875, %v1918_v20  ;;  %v1901_v21 = vunpack.c.l.bf16 %v1895_v27  ;;  %v1902_v55 = vunpack.c.h.bf16 %v1895_v27  ;;  %v3474_v27 = vld [vmem:[#allocation11 + $0x8] sm:$0xff] }
 0x1de   :  { %2271 = vmatpush.bf16.msra.mxu0 %v3474_v27  ;;  %2285 = vmatpush.bf16.msra.mxu1 %v3482_v17 }
 0x1df   :  { %v1933_v14 = vpack.c.bf16 %v1926_v51, %v1925_v28  ;;  %v1909_v25 = vadd.f32 %v1901_v21, %v3928_v52  ;;  %v1910_v26 = vadd.f32 %v1902_v55, %v3930_v53  ;;  %v1833_v21 = vmul.f32 0.5, %v3920_v30  ;;  %v3495_v53 = vld [vmem:[#allocation11 + $0xb0] sm:$0xff] }
 0x1e0   :  { %v1834_v55 = vmul.f32 0.5, %v3922_v33  ;;  %v3473_v33 = vld [vmem:[#allocation11] sm:$0xff] }
 0x1e1   :  { %v1915_v29 = vpack.c.bf16 %v1910_v26, %v1909_v25  ;;  %v1937_v37 = vunpack.c.l.bf16 %v1933_v14  ;;  %v1938_v38 = vunpack.c.h.bf16 %v1933_v14 }
 0x1e2   :  { %2272 = vmatpush.bf16.msra.mxu0 %v3473_v33 }
 0x1e3   :  { %v1921_v42 = vunpack.c.l.bf16 %v1915_v29  ;;  %v1922_v43 = vunpack.c.h.bf16 %v1915_v29  ;;  %3535 = vtanh.f32 %v1937_v37  ;;  %v1763_v29 = vadd.f32 %v3946_v40, %v1749_v57 }
 0x1e4   :  { %3537 = vtanh.f32 %v1938_v38  ;;  %v3481_v38 = vld [vmem:[#allocation11 + $0x40] sm:$0xff] }
 0x1e5   :  { %v1929_v44 = vmul.f32 0.796875, %v1921_v42  ;;  %v1930_v15 = vmul.f32 0.796875, %v1922_v43  ;;  %v3496_v42 = vld [vmem:[#allocation11 + $0xb8] sm:$0xff]  ;;  %v1841_v43 = vpack.c.bf16 %v1834_v55, %v1833_v21  ;;  %2286 = vmatpush.bf16.msra.mxu1 %v3481_v38  ;;  %v3501_v21 = vld [vmem:[#allocation11 + $0xe0] sm:$0xff] }
 0x1e6   :  { %2293 = vmatpush.bf16.msra.mxu2 %v3496_v42 }
 0x1e7   :  { %v1935_v50 = vpack.c.bf16 %v1930_v15, %v1929_v44  ;;  %v3504_v15 = vld [vmem:[#allocation11 + $0xf8] sm:$0xff]  ;;  %v1977_v62 = vunpack.c.l.bf16 %v1841_v43 }
 0x1e8   :  { %2307 = vmatpush.bf16.msra.mxu3 %v3504_v15 }
 0x1e9   :  { %v3536_v56 = vpop.eup %3535  ;;  %v1941_v63 = vunpack.c.l.bf16 %v1935_v50  ;;  %v1942_v0 = vunpack.c.h.bf16 %v1935_v50 }
 0x1ea   :  { %v3538_v1 = vpop.eup %3537  ;;  %2294 = vmatpush.bf16.msra.mxu2 %v3495_v53 }
 0x1eb   :  { %3539 = vtanh.f32 %v1941_v63  ;;  %v1953_v48 = vpack.c.bf16 %v3538_v1, %v3536_v56 }
 0x1ec   :  { %v1802_v3 = vpop.f32.mrf.mxu2  ;;  %v1816_v4 = vpop.f32.mrf.mxu3  ;;  %3541 = vtanh.f32 %v1942_v0  ;;  %2308 = vmatpush.bf16.msra.mxu3 %v3503_v47 }
 0x1ed   :  { %v1803_v5 = vadd.f32 %v1802_v3, %v1789_v31  ;;  %v1957_v58 = vunpack.c.l.bf16 %v1953_v48  ;;  %v1958_v32 = vunpack.c.h.bf16 %v1953_v48  ;;  %v1978_v3 = vunpack.c.h.bf16 %v1841_v43 }
 0x1ee   :  { %v1982_v48 = vunpack.c.h.bf16 %v1843_v10  ;;  %2295 = vmatpush.bf16.msra.mxu2 %v3494_v6 }
 0x1ef   :  { %v1817_v7 = vadd.f32 %v1816_v4, %v1803_v5  ;;  %v1965_v22 = vadd.f32 1.0, %v1957_v58  ;;  %v1966_v23 = vadd.f32 1.0, %v1958_v32  ;;  %v1981_v4 = vunpack.c.l.bf16 %v1843_v10  ;;  %v3498_v10 = vld [vmem:[#allocation11 + $0xc8] sm:$0xff] }
 0x1f1   :  { %v1822_v59 = vpack.c.bf16 %v1817_v7, %v1761_v49  ;;  %v3540_v18 = vpop.eup %3539  ;;  %v1973_v44 = vpack.c.bf16 %v1966_v23, %v1965_v22  ;;  %v3502_v7 = vld [vmem:[#allocation11 + $0xe8] sm:$0xff] }
 0x1f2   :  { %v3542_v28 = vpop.eup %3541  ;;  %2309 = vmatpush.bf16.msra.mxu3 %v3502_v7 }
 0x1f3   :  { %v3948_v19 = vunpack.c.l.bf16 %v1822_v59  ;;  %v3950_v20 = vunpack.c.h.bf16 %v1822_v59  ;;  %v1955_v8 = vpack.c.bf16 %v3542_v28, %v3540_v18  ;;  %v1985_v9 = vunpack.c.l.bf16 %v1973_v44 }
 0x1f4   :  { %v1804_v51 = vpop.f32.mrf.mxu2  ;;  %v1818_v34 = vpop.f32.mrf.mxu3  ;;  %v1986_v63 = vunpack.c.h.bf16 %v1973_v44 }
 0x1f5   :  { %v1847_v14 = vmul.f32 0.044677734, %v3948_v19  ;;  %v1848_v25 = vmul.f32 0.044677734, %v3950_v20  ;;  %v1805_v26 = vadd.f32 %v1804_v51, %v1791_v60  ;;  %v1961_v39 = vunpack.c.l.bf16 %v1955_v8  ;;  %v3493_v51 = vld [vmem:[#allocation11 + $0xa0] sm:$0xff] }
 0x1f6   :  { %v1962_v41 = vunpack.c.h.bf16 %v1955_v8  ;;  %v1993_v58 = vmul.f32 %v1985_v9, %v1977_v62  ;;  %v1994_v59 = vmul.f32 %v1986_v63, %v1978_v3  ;;  %2296 = vmatpush.bf16.msra.mxu2 %v3493_v51  ;;  %2310 = vmatpush.bf16.msra.mxu3 %v3501_v21  ;;  %v3492_v8 = vld [vmem:[#allocation11 + $0x98] sm:$0xff]  ;;  %v3489_v62 = vld [vmem:[#allocation11 + $0x80] sm:$0xff] }
 0x1f7   :  { %v1854_v30 = vpack.c.bf16 %v1848_v25, %v1847_v14  ;;  %v1819_v37 = vadd.f32 %v1818_v34, %v1805_v26  ;;  %v1969_v40 = vadd.f32 1.0, %v1961_v39  ;;  %v3491_v39 = vld [vmem:[#allocation11 + $0x90] sm:$0xff]  ;;  %v3497_v9 = vld [vmem:[#allocation11 + $0xc0] sm:$0xff] }
 0x1f8   :  { %v1970_v52 = vadd.f32 1.0, %v1962_v41  ;;  %v3499_v41 = vld [vmem:[#allocation11 + $0xd0] sm:$0xff] }
 0x1f9   :  { %v1859_v16 = vunpack.c.l.bf16 %v1854_v30  ;;  %v1860_v45 = vunpack.c.h.bf16 %v1854_v30  ;;  %v1824_v46 = vpack.c.bf16 %v1819_v37, %v1763_v29  ;;  %v3500_v29 = vld [vmem:[#allocation11 + $0xd8] sm:$0xff] }
 0x1fa   :  { %v1975_v54 = vpack.c.bf16 %v1970_v52, %v1969_v40  ;;  %2297 = vmatpush.bf16.msra.mxu2 %v3492_v8  ;;  %2311 = vmatpush.bf16.msra.mxu3 %v3500_v29  ;;  %v3490_v40 = vld [vmem:[#allocation11 + $0x88] sm:$0xff] }
 0x1fb   :  { %v1867_v50 = vmul.f32 %v1859_v16, %v3948_v19  ;;  %v1868_v56 = vmul.f32 %v1860_v45, %v3950_v20  ;;  %v3961_v31 = vunpack.c.l.bf16 %v1824_v46  ;;  %v3963_v61 = vunpack.c.h.bf16 %v1824_v46 }
 0x1fc   :  { %v1989_v5 = vunpack.c.l.bf16 %v1975_v54  ;;  %v1990_v49 = vunpack.c.h.bf16 %v1975_v54 }
 0x1fd   :  { %v1874_v0 = vpack.c.bf16 %v1868_v56, %v1867_v50  ;;  %v1851_v1 = vmul.f32 0.044677734, %v3961_v31  ;;  %v1852_v2 = vmul.f32 0.044677734, %v3963_v61 }
 0x1fe   :  { %v1997_v32 = vmul.f32 %v1989_v5, %v1981_v4  ;;  %v1998_v12 = vmul.f32 %v1990_v49, %v1982_v48  ;;  %2298 = vmatpush.bf16.msra.mxu2 %v3491_v39  ;;  %2312 = vmatpush.bf16.msra.mxu3 %v3499_v41 }
 0x1ff   :  { %v1879_v11 = vunpack.c.l.bf16 %v1874_v0  ;;  %v1880_v13 = vunpack.c.h.bf16 %v1874_v0  ;;  %v1856_v24 = vpack.c.bf16 %v1852_v2, %v1851_v1 }
 0x200   :  { %v2001_v17 = vpack.c.bf16 %v1997_v32, %v1993_v58  ;;  %v2002_v28 = vpack.c.bf16 %v1998_v12, %v1994_v59  ;;  %v1835_v59 = vmul.f32 0.5, %v3948_v19  ;;  %v1836_v12 = vmul.f32 0.5, %v3950_v20 }
 0x201   :  { %v1887_v57 = vmul.f32 %v1879_v11, %v3948_v19  ;;  %v1888_v18 = vmul.f32 %v1880_v13, %v3950_v20  ;;  %v1863_v60 = vunpack.c.l.bf16 %v1856_v24  ;;  %v1864_v27 = vunpack.c.h.bf16 %v1856_v24 }
 0x202   :  { %2273 = vmatmul.bf16.vlgmr.msra.gmra.mxu0 %v2001_v17  ;;  %2287 = vmatmul.bf16.vlgmr.msra.gmra.mxu1 %v2002_v28  ;;  %v1842_v51 = vpack.c.bf16 %v1836_v12, %v1835_v59 }
 0x203   :  { %v1894_v55 = vpack.c.bf16 %v1888_v18, %v1887_v57  ;;  %v1871_v22 = vmul.f32 %v1863_v60, %v3961_v31  ;;  %v1872_v23 = vmul.f32 %v1864_v27, %v3963_v61  ;;  %2299 = vmatpush.bf16.msra.mxu2 %v3490_v40  ;;  %2313 = vmatpush.bf16.msra.mxu3 %v3498_v10  ;;  %v1839_v57 = vmul.f32 0.5, %v3961_v31 }
 0x204   :  { %v1840_v18 = vmul.f32 0.5, %v3963_v61  ;;  %v1980_v8 = vunpack.c.h.bf16 %v1842_v51 }
 0x205   :  { %v1899_v14 = vunpack.c.l.bf16 %v1894_v55  ;;  %v1900_v25 = vunpack.c.h.bf16 %v1894_v55  ;;  %v1876_v26 = vpack.c.bf16 %v1872_v23, %v1871_v22 }
 0x206   :  { %v1844_v21 = vpack.c.bf16 %v1840_v18, %v1839_v57 }
 0x207   :  { %v1907_v34 = vadd.f32 %v1899_v14, %v3948_v19  ;;  %v1908_v35 = vadd.f32 %v1900_v25, %v3950_v20  ;;  %v1883_v36 = vunpack.c.l.bf16 %v1876_v26  ;;  %v1884_v30 = vunpack.c.h.bf16 %v1876_v26  ;;  %2300 = vmatpush.bf16.msra.mxu2 %v3489_v62  ;;  %2314 = vmatpush.bf16.msra.mxu3 %v3497_v9 }
 0x208   :  { %v1979_v26 = vunpack.c.l.bf16 %v1842_v51  ;;  %v1983_v19 = vunpack.c.l.bf16 %v1844_v21  ;;  %v1984_v20 = vunpack.c.h.bf16 %v1844_v21 }
 0x209   :  { %v1914_v37 = vpack.c.bf16 %v1908_v35, %v1907_v34  ;;  %v1891_v33 = vmul.f32 %v1883_v36, %v3961_v31  ;;  %v1892_v38 = vmul.f32 %v1884_v30, %v3963_v61 }
 0x20b   :  { %v1919_v42 = vunpack.c.l.bf16 %v1914_v37  ;;  %v1920_v43 = vunpack.c.h.bf16 %v1914_v37  ;;  %v1896_v44 = vpack.c.bf16 %v1892_v38, %v1891_v33  ;;  %v3518_v38 = vld [vmem:[%s3996_s6] ss:$0 sm:$0xff]  ;;  %s3745_s6 = smov [#allocation13]  }
 0x20c   :  { %s2357_s10 = sshll.u32 %s3745_s6, 4  ;;  %s2358_s10 = int_to_ptr.vmem [resolvable:$true] %s2357_s10 }
 0x20d   :  { %v1927_v15 = vmul.f32 0.796875, %v1919_v42  ;;  %v1928_v16 = vmul.f32 0.796875, %v1920_v43  ;;  %v1903_v45 = vunpack.c.l.bf16 %v1896_v44  ;;  %v1904_v46 = vunpack.c.h.bf16 %v1896_v44 }
 0x20f   :  { %v1934_v52 = vpack.c.bf16 %v1928_v16, %v1927_v15  ;;  %v1911_v53 = vadd.f32 %v1903_v45, %v3961_v31  ;;  %v1912_v47 = vadd.f32 %v1904_v46, %v3963_v61 }
 0x211   :  { %v1916_v50 = vpack.c.bf16 %v1912_v47, %v1911_v53  ;;  %v1939_v56 = vunpack.c.l.bf16 %v1934_v52  ;;  %v1940_v54 = vunpack.c.h.bf16 %v1934_v52 }
 0x213   :  { %v1923_v63 = vunpack.c.l.bf16 %v1916_v50  ;;  %v1924_v0 = vunpack.c.h.bf16 %v1916_v50  ;;  %3543 = vtanh.f32 %v1939_v56 }
 0x214   :  { %3545 = vtanh.f32 %v1940_v54 }
 0x215   :  { %v1931_v1 = vmul.f32 0.796875, %v1923_v63  ;;  %v1932_v2 = vmul.f32 0.796875, %v1924_v0 }
 0x217   :  { %v1936_v3 = vpack.c.bf16 %v1932_v2, %v1931_v1 }
 0x219   :  { %v3544_v4 = vpop.eup %3543  ;;  %v1943_v5 = vunpack.c.l.bf16 %v1936_v3  ;;  %v1944_v48 = vunpack.c.h.bf16 %v1936_v3 }
 0x21a   :  { %v3546_v49 = vpop.eup %3545 }
 0x21b   :  { %3547 = vtanh.f32 %v1943_v5  ;;  %v1954_v6 = vpack.c.bf16 %v3546_v49, %v3544_v4 }
 0x21c   :  { %3549 = vtanh.f32 %v1944_v48 }
 0x21d   :  { %v1959_v7 = vunpack.c.l.bf16 %v1954_v6  ;;  %v1960_v11 = vunpack.c.h.bf16 %v1954_v6 }
 0x21f   :  { %v1967_v24 = vadd.f32 1.0, %v1959_v7  ;;  %v1968_v58 = vadd.f32 1.0, %v1960_v11 }
 0x221   :  { %v3548_v13 = vpop.eup %3547  ;;  %v1974_v28 = vpack.c.bf16 %v1968_v58, %v1967_v24 }
 0x222   :  { %v3550_v32 = vpop.eup %3549 }
 0x223   :  { %v1956_v60 = vpack.c.bf16 %v3550_v32, %v3548_v13  ;;  %v1987_v14 = vunpack.c.l.bf16 %v1974_v28  ;;  %v1988_v25 = vunpack.c.h.bf16 %v1974_v28 }
 0x225   :  { %v1963_v27 = vunpack.c.l.bf16 %v1956_v60  ;;  %v1964_v17 = vunpack.c.h.bf16 %v1956_v60  ;;  %v1995_v31 = vmul.f32 %v1987_v14, %v1979_v26  ;;  %v1996_v61 = vmul.f32 %v1988_v25, %v1980_v8 }
 0x227   :  { %v1971_v55 = vadd.f32 1.0, %v1963_v27  ;;  %v1972_v22 = vadd.f32 1.0, %v1964_v17 }
 0x229   :  { %v1976_v23 = vpack.c.bf16 %v1972_v22, %v1971_v55 }
 0x22b   :  { %v1991_v29 = vunpack.c.l.bf16 %v1976_v23  ;;  %v1992_v34 = vunpack.c.h.bf16 %v1976_v23 }
 0x22d   :  { %v1999_v35 = vmul.f32 %v1991_v29, %v1983_v19  ;;  %v2000_v36 = vmul.f32 %v1992_v34, %v1984_v20 }
 0x22f   :  { %v2003_v30 = vpack.c.bf16 %v1999_v35, %v1995_v31  ;;  %v2004_v37 = vpack.c.bf16 %v2000_v36, %v1996_v61 }
 0x231   :  { %2301 = vmatmul.bf16.vlgmr.msra.gmra.mxu2 %v2003_v30  ;;  %2315 = vmatmul.bf16.vlgmr.msra.gmra.mxu3 %v2004_v37 }
 0x27f   :  { %v2274_v33 = vpop.f32.mrf.mxu0  ;;  %v2288_v41 = vpop.f32.mrf.mxu1 }
 0x280   :  { %v2275_v39 = vadd.f32 %v3518_v38, %v2274_v33 }
 0x282   :  { %v2289_v42 = vadd.f32 %v2288_v41, %v2275_v39 }
 0x287   :  { %v2276_v43 = vpop.f32.mrf.mxu0  ;;  %v2290_v10 = vpop.f32.mrf.mxu1 }
 0x288   :  { %v2277_v45 = vadd.f32 %v3518_v38, %v2276_v43 }
 0x28a   :  { %v2291_v52 = vadd.f32 %v2290_v10, %v2277_v45 }
 0x2b4   :  { %v2302_v44 = vpop.f32.mrf.mxu2  ;;  %v2316_v15 = vpop.f32.mrf.mxu3 }
 0x2b5   :  { %v2303_v16 = vadd.f32 %v2302_v44, %v2289_v42 }
 0x2b7   :  { %v2317_v46 = vadd.f32 %v2316_v15, %v2303_v16 }
 0x2b9   :  { %v2321_v40 = vmul.f32 %v2317_v46, %v2317_v46 }
 0x2bb   :  { %2323 = vadd.xlane.f32.xlu0 %v2321_v40 }
 0x2bc   :  { %v2304_v53 = vpop.f32.mrf.mxu2  ;;  %v2318_v50 = vpop.f32.mrf.mxu3 }
 0x2bd   :  { %v2305_v47 = vadd.f32 %v2304_v53, %v2291_v52 }
 0x2bf   :  { %v2319_v56 = vadd.f32 %v2318_v50, %v2305_v47 }
 0x2c1   :  { %v2322_v54 = vmul.f32 %v2319_v56, %v2319_v56 }
 0x2c3   :  { %2325 = vadd.xlane.f32.xlu0 %v2322_v54 }
 0x32e   :  { %v2324_v62 = vpop.xlane.xlu0 %2323 }
 0x32f   :  { %v2327_v9 = vmax.f32 %v2324_v62, 1e-24 }
 0x331   :  { %3551 = vrsqrt.f32 %v2327_v9  ;;  %vm2335_vm1 = vweird.f32 %v2327_v9 }
 0x336   :  { %v2326_v63 = vpop.xlane.xlu0 %2325 }
 0x337   :  { %v3552_v0 = vpop.eup %3551  ;;  %v2328_v1 = vmax.f32 %v2326_v63, 1e-24 }
 0x338   :  { %v2330_v2 = vmul.f32 %v3552_v0, %v2327_v9  ;;  %vm2336_vm0 = vweird.f32 %v3552_v0 }
 0x339   :  { %3553 = vrsqrt.f32 %v2328_v1  ;;  %vm2337_vm2 = vmor %vm2335_vm1, %vm2336_vm0  ;;  %vm2345_vm4 = vweird.f32 %v2328_v1 }
 0x33a   :  { %v2331_v3 = vmul.f32 %v3552_v0, %v2330_v2 }
 0x33c   :  { %v2332_v4 = vmul.f32 0.5, %v2331_v3 }
 0x33e   :  { %v2333_v5 = vsub.f32 1.5, %v2332_v4 }
 0x33f   :  { %v3554_v48 = vpop.eup %3553 }
 0x340   :  { %v2334_v49 = vmul.f32 %v3552_v0, %v2333_v5  ;;  %v2340_v6 = vmul.f32 %v3554_v48, %v2328_v1  ;;  %vm2346_vm3 = vweird.f32 %v3554_v48 }
 0x341   :  { %vm2347_vm5 = vmor %vm2345_vm4, %vm2346_vm3 }
 0x342   :  { %v2338_v7 = vsel %vm2337_vm2, %v3552_v0, %v2334_v49  ;;  %v2341_v11 = vmul.f32 %v3554_v48, %v2340_v6 }
 0x343   :  { %v2349_v13 = vmul.f32 %v2338_v7, %v2317_v46 }
 0x344   :  { %v2342_v24 = vmul.f32 0.5, %v2341_v11 }
 0x345   :  { %2351 = vst [vmem:[#allocation13] sm:$0xff] %v2349_v13 }
 0x346   :  { %v2343_v58 = vsub.f32 1.5, %v2342_v24 }
 0x348   :  { %v2344_v32 = vmul.f32 %v3554_v48, %v2343_v58 }
 0x34a   :  { %v2348_v59 = vsel %vm2347_vm5, %v3554_v48, %v2344_v32 }
 0x34b   :  { %v2350_v12 = vmul.f32 %v2348_v59, %v2319_v56 }
 0x34d   :  { %2352 = vst [vmem:[#allocation13 + $0x8] sm:$0xff] %v2350_v12 }
 0x34e   :  { %2365 = dma.vmem_to_hbm [thread:$0]  %s2358_s10, 256, %s2360_s13, [#allocation4], %s3738_s19, %s3738_s19, %s3739_s20  }
 0x34f   :  { %3731 = dma.done.wait [#allocation4], 256  }
 0x350   :  { %3732 = vsyncadd [#allocation4], 4294967040 }
 0x351   :  { %2370 = vsyncpa [#allocation3], 1 }
 0x352   :  { %2371 = vsyncpa [#allocation6], 1 }
 0x353   :  { %2372 = vsyncpa [#allocation9], 1 }
 0x354   :  { %2373 = vsyncpa [#allocation12], 1 }
 0x355   :  { %2374 = vsyncpa [#allocation4], 1 }

</bundles_post_ra>
